<compile_context>
chip_gen: v7x
topology: tpu7x:2x2x1
jax: 0.10.0
libtpu: 0.0.40
codegen_flags: <defaults>
</compile_context>

<pallas_src>
import jax
import jax.numpy as jnp
from jax.experimental import pallas as pl
from jax.experimental.pallas import tpu as pltpu

# ---------------- configuration (small, consistent with the module) ----------------
NODE_NUM   = 16
HIDDEN     = 32
INPUT_DIM  = 4
OUTPUT_DIM = 4          # must equal INPUT_DIM (gcn_conv applied twice)
NUM_LAYERS = 2
NUM_CLASS  = 3
EXTRA_DIM  = 0
SEQ_LEN    = 8
BATCH      = 2          # NUM_LAYERS * BATCH == INPUT_DIM + EXTRA_DIM
D_DIM      = INPUT_DIM + EXTRA_DIM


# ---------------- packed parameter slab layout (8-row-aligned blocks) ---------------
def _align8(n):
    return (n + 7) // 8 * 8

_r = 0
R_WSTEP = _r; _r = _align8(_r + 2 * HIDDEN)      # (2H, 8H)  fused recurrence weights
R_WIH1  = _r; _r = _align8(_r + NODE_NUM)        # (N, 4H)   LSTM-1 input weights
R_B1    = _r; _r = _align8(_r + 1)               # (1, 4H)   LSTM-1 fused bias
R_B2    = _r; _r = _align8(_r + 1)               # (1, 4H)   LSTM-2 fused bias
R_MW1   = _r; _r = _align8(_r + HIDDEN)          # (H, H)    mlp linear 1
R_MB1   = _r; _r = _align8(_r + 1)               # (1, H)
R_MW2   = _r; _r = _align8(_r + HIDDEN)          # (H, N)    mlp linear 2
R_MB2   = _r; _r = _align8(_r + 1)               # (1, N)
R_AWT   = _r; _r = _align8(_r + HIDDEN)          # (H, D)    folded lin->cheb->cheb->cmlp.w1 (T)
R_ABT   = _r; _r = _align8(_r + HIDDEN)          # (H, 1)
R_BWT   = _r; _r = _align8(_r + D_DIM)           # (D, H)    folded cmlp.w2->lin (T)
R_BBT   = _r; _r = _align8(_r + D_DIM)           # (D, 1)
R_WPW   = _r; _r = _align8(_r + NODE_NUM)        # (N, D*C)  block-interleaved predict weight
R_BP    = _r; _r = _align8(_r + 1)               # (1, C)
SLAB_ROWS = _r
SLAB_COLS = 8 * HIDDEN                           # 256 lanes (widest block = W_step)


# ---------------------------- fused Pallas kernel -----------------------------------
def _evolgcn_fused_kernel(x_ref, w_ref, o_ref):
    H, B, T = HIDDEN, BATCH, SEQ_LEN
    D, N, C = D_DIM, NODE_NUM, NUM_CLASS
    H4, H8 = 4 * H, 8 * H

    # ---- carve the packed parameter slab (static slices) ----
    w_step = w_ref[R_WSTEP:R_WSTEP + 2 * H, :]           # (2H, 8H)
    wih1   = w_ref[R_WIH1:R_WIH1 + N, 0:H4]              # (N, 4H)
    b1     = w_ref[R_B1:R_B1 + 1, 0:H4]                  # (1, 4H)
    b2     = w_ref[R_B2:R_B2 + 1, 0:H4]                  # (1, 4H)
    mw1    = w_ref[R_MW1:R_MW1 + H, 0:H]                 # (H, H)
    mb1    = w_ref[R_MB1:R_MB1 + 1, 0:H]                 # (1, H)
    mw2    = w_ref[R_MW2:R_MW2 + H, 0:N]                 # (H, N)
    mb2    = w_ref[R_MB2:R_MB2 + 1, 0:N]                 # (1, N)
    awt    = w_ref[R_AWT:R_AWT + H, 0:D]                 # (H, D)
    abt    = w_ref[R_ABT:R_ABT + H, 0:1]                 # (H, 1)
    bwt    = w_ref[R_BWT:R_BWT + D, 0:H]                 # (D, H)
    bbt    = w_ref[R_BBT:R_BBT + D, 0:1]                 # (D, 1)
    wp_w   = w_ref[R_WPW:R_WPW + N, 0:D * C]             # (N, D*C)
    bp     = w_ref[R_BP:R_BP + 1, 0:C]                   # (1, C)

    # ---- LSTM layer-1 input projection for the whole sequence: one MXU pass ----
    xg = jnp.dot(x_ref[...], wih1, preferred_element_type=jnp.float32) + b1   # (T*B, 4H)

    def lstm_cell(pre, c):
        # 2 EUP passes over the fused (B,4H) pre-activation instead of 4 per-gate ones.
        # PyTorch gate column order: [i, f, g, o].
        sg = jax.nn.sigmoid(pre)
        th = jnp.tanh(pre)
        i, f, o = sg[:, 0:H], sg[:, H:2 * H], sg[:, 3 * H:4 * H]
        g = th[:, 2 * H:3 * H]
        c_new = f * c + i * g
        return o * jnp.tanh(c_new), c_new

    zer = jnp.zeros((B, H), jnp.float32)
    h1, c1, h2, c2 = zer, zer, zer, zer
    rec1 = jnp.zeros((B, H4), jnp.float32)       # h1(t-1) @ whh1 contribution to pre1(t)

    # Fully static unroll (T=8).  One combined (B,2H)x(2H,8H) matmul per timestep
    # replaces the three per-step recurrent matmuls (wavefront over the 2 layers).
    for t in range(T):
        pre1 = xg[t * B:(t + 1) * B, :] + rec1
        h1, c1 = lstm_cell(pre1, c1)
        zz = jnp.dot(jnp.concatenate([h1, h2], axis=1), w_step,
                     preferred_element_type=jnp.float32)          # (B, 8H)
        pre2 = zz[:, 0:H4] + b2
        rec1 = zz[:, H4:H8]
        h2, c2 = lstm_cell(pre2, c2)

    # hn.reshape(-1, hidden): layer-major stack of final hidden states
    hn = jnp.concatenate([h1, h2], axis=0)                        # (L*B, H)

    # ---- mlp: Linear -> ReLU -> Linear ----
    # TODO(synk): torch_geometric MLP batch-norm/dropout omitted (identity at eval
    # with default running stats); modeled as Linear->ReLU->Linear.
    t1 = jnp.maximum(
        jnp.dot(hn, mw1, preferred_element_type=jnp.float32) + mb1, 0.0)
    m = jnp.dot(t1, mw2, preferred_element_type=jnp.float32) + mb2            # (L*B, N)

    # ---- folded gcn chain, evaluated in transposed orientation (no transposes) ----
    zt = jnp.maximum(
        jnp.dot(awt, m, preferred_element_type=jnp.float32) + abt, 0.0)       # (H, N)
    h6t = jnp.dot(bwt, zt, preferred_element_type=jnp.float32) + bbt          # (D, N)

    # ---- predict: flatten(h6t) @ Wp + bp as ONE matmul against the block-interleaved
    # weight, then a static diagonal fold (no in-kernel relayout of h6t). ----
    gg = jnp.dot(h6t, wp_w, preferred_element_type=jnp.float32)               # (D, D*C)
    acc = bp
    for r in range(D):
        acc = acc + gg[r:r + 1, r * C:(r + 1) * C]
    o_ref[...] = acc


# ---------------------------- parameter construction --------------------------------
def _lin_params(key, fan_in, fan_out):
    k1, k2 = jax.random.split(key)
    bound = 1.0 / jnp.sqrt(jnp.float32(fan_in))
    return {
        "w_t": jax.random.uniform(k1, (fan_in, fan_out), jnp.float32, -bound, bound),
        "b":   jax.random.uniform(k2, (1, fan_out), jnp.float32, -bound, bound),
    }


def _lstm_params(key, input_size, hidden_size):
    k1, k2, k3 = jax.random.split(key, 3)
    bound = 1.0 / jnp.sqrt(jnp.float32(hidden_size))
    return {
        "w_ih_t": jax.random.uniform(k1, (input_size, 4 * hidden_size), jnp.float32, -bound, bound),
        "w_hh_t": jax.random.uniform(k2, (hidden_size, 4 * hidden_size), jnp.float32, -bound, bound),
        # b = b_ih + b_hh fused
        "b":      jax.random.uniform(k3, (1, 4 * hidden_size), jnp.float32, -bound, bound),
    }


def init_params(key):
    keys = jax.random.split(key, 12)
    params = {}
    # nn.LSTM(input_size=node_num, hidden_size=hidden_dim, num_layers=2, batch_first=True)
    params["lstm"] = [
        _lstm_params(keys[0], NODE_NUM, HIDDEN),
        _lstm_params(keys[1], HIDDEN, HIDDEN),
    ]
    # MLP(hidden_dim -> hidden_dim -> node_num)
    m1 = _lin_params(keys[2], HIDDEN, HIDDEN)
    m2 = _lin_params(keys[3], HIDDEN, NODE_NUM)
    params["mlp"] = {"w1_t": m1["w_t"], "b1": m1["b"], "w2_t": m2["w_t"], "b2": m2["b"]}
    # nn.Linear(input_dim+extra_dim, input_dim+extra_dim)
    params["lin"] = _lin_params(keys[4], D_DIM, D_DIM)
    # ChebConv(input_dim+extra_dim, output_dim+extra_dim, K=1): Theta_0 linear + bias
    params["cheb"] = _lin_params(keys[5], D_DIM, OUTPUT_DIM + EXTRA_DIM)
    # cmlp: MLP(input_dim -> hidden_dim -> output_dim)
    c1 = _lin_params(keys[6], D_DIM, HIDDEN)
    c2 = _lin_params(keys[7], HIDDEN, OUTPUT_DIM + EXTRA_DIM)
    params["cmlp"] = {"w1_t": c1["w_t"], "b1": c1["b"], "w2_t": c2["w_t"], "b2": c2["b"]}
    # Predict((input_dim+extra_dim)*node_num, num_class)
    # TODO(synk): Predict module is not defined upstream; modeled as a single Linear.
    params["predict"] = _lin_params(keys[8], D_DIM * NODE_NUM, NUM_CLASS)
    return params


def prepare_kernel_params(params):
    """One-time parameter prep (plain JAX): fold the bias-affine gcn chain, build the
    fused recurrence weight W_step and the block-interleaved predict weight, and pack
    everything into a single 8-row-aligned VMEM slab (one DMA)."""
    H, N, D, C = HIDDEN, NODE_NUM, D_DIM, NUM_CLASS
    l1, l2 = params["lstm"]
    mlp = params["mlp"]

    # fold lin -> cheb -> cheb -> cmlp.w1 and cmlp.w2 -> lin into two affines
    lin_w, lin_b = params["lin"]["w_t"], params["lin"]["b"]
    chb_w, chb_b = params["cheb"]["w_t"], params["cheb"]["b"]
    c1_w, c1_b = params["cmlp"]["w1_t"], params["cmlp"]["b1"]
    c2_w, c2_b = params["cmlp"]["w2_t"], params["cmlp"]["b2"]
    a_w = lin_w @ chb_w @ chb_w @ c1_w                                # (D, H)
    a_b = ((lin_b @ chb_w + chb_b) @ chb_w + chb_b) @ c1_w + c1_b     # (1, H)
    b_w = c2_w @ lin_w                                                # (H, D)
    b_b = c2_b @ lin_w + lin_b                                        # (1, D)

    # fused recurrence weight: [h1(t), h2(t-1)] @ W_step
    #   cols 0:4H   -> h1@wih2 + h2@whh2  (= pre2(t) - b2)
    #   cols 4H:8H  -> h1@whh1            (= rec1 for pre1(t+1))
    w_step = jnp.zeros((2 * H, 8 * H), jnp.float32)
    w_step = w_step.at[0:H, 0:4 * H].set(l2["w_ih_t"])
    w_step = w_step.at[H:2 * H, 0:4 * H].set(l2["w_hh_t"])
    w_step = w_step.at[0:H, 4 * H:8 * H].set(l1["w_hh_t"])

    # block-interleaved predict weight: wp_wide[n, r*C+c] = Wp[r*N+n, c]
    wp = params["predict"]["w_t"]
    wp_wide = wp.reshape(D, N, C).transpose(1, 0, 2).reshape(N, D * C)

    slab = jnp.zeros((SLAB_ROWS, SLAB_COLS), jnp.float32)

    def put(s, row, blk):
        return s.at[row:row + blk.shape[0], 0:blk.shape[1]].set(blk)

    slab = put(slab, R_WSTEP, w_step)
    slab = put(slab, R_WIH1, l1["w_ih_t"])
    slab = put(slab, R_B1, l1["b"])
    slab = put(slab, R_B2, l2["b"])
    slab = put(slab, R_MW1, mlp["w1_t"])
    slab = put(slab, R_MB1, mlp["b1"])
    slab = put(slab, R_MW2, mlp["w2_t"])
    slab = put(slab, R_MB2, mlp["b2"])
    slab = put(slab, R_AWT, a_w.T)
    slab = put(slab, R_ABT, a_b.T)
    slab = put(slab, R_BWT, b_w.T)
    slab = put(slab, R_BBT, b_b.T)
    slab = put(slab, R_WPW, wp_wide)
    slab = put(slab, R_BP, params["predict"]["b"])
    return slab


# ---------------------------- forward (single pallas_call) --------------------------
def evolgcn_forward(param_slab, fea_list):
    # DataUtil.pre_deal_feature ~ stack the per-timestep (B, N) features into an LSTM
    # sequence; rows ordered (t0_b0, t0_b1, t1_b0, ...) so the kernel slices timestep
    # t as rows [t*B, t*B + B).
    x2d = jnp.concatenate([f.reshape(-1, f.shape[-1]) for f in fea_list], axis=0)

    vmem = pl.BlockSpec(memory_space=pltpu.MemorySpace.VMEM)
    return pl.pallas_call(
        _evolgcn_fused_kernel,
        out_shape=jax.ShapeDtypeStruct((1, NUM_CLASS), jnp.float32),
        in_specs=[vmem, vmem],
        out_specs=vmem,
    )(x2d, param_slab)


# ---------------------------- pure-JAX reference (unfolded params) -------------------
def evolgcn_reference(params, fea_list):
    H, B, T = HIDDEN, BATCH, SEQ_LEN
    l1, l2 = params["lstm"]

    def cell(pre, c):
        i = jax.nn.sigmoid(pre[:, 0:H]); f = jax.nn.sigmoid(pre[:, H:2 * H])
        g = jnp.tanh(pre[:, 2 * H:3 * H]); o = jax.nn.sigmoid(pre[:, 3 * H:4 * H])
        c = f * c + i * g
        return o * jnp.tanh(c), c

    h1 = c1 = h2 = c2 = jnp.zeros((B, H), jnp.float32)
    for t in range(T):
        xt = fea_list[t].reshape(-1, fea_list[t].shape[-1])
        pre1 = xt @ l1["w_ih_t"] + h1 @ l1["w_hh_t"] + l1["b"]
        h1, c1 = cell(pre1, c1)
        pre2 = h1 @ l2["w_ih_t"] + h2 @ l2["w_hh_t"] + l2["b"]
        h2, c2 = cell(pre2, c2)
    hn = jnp.concatenate([h1, h2], axis=0)
    mlp = params["mlp"]
    out = jnp.maximum(hn @ mlp["w1_t"] + mlp["b1"], 0.0) @ mlp["w2_t"] + mlp["b2"]
    x = out.T
    lin, chb, cm = params["lin"], params["cheb"], params["cmlp"]
    x = x @ lin["w_t"] + lin["b"]
    x = x @ chb["w_t"] + chb["b"]
    x = x @ chb["w_t"] + chb["b"]
    x = jnp.maximum(x @ cm["w1_t"] + cm["b1"], 0.0)
    x = x @ cm["w2_t"] + cm["b2"]
    x = x @ lin["w_t"] + lin["b"]
    x = x.T.reshape(1, -1)
    pr = params["predict"]
    return x @ pr["w_t"] + pr["b"]


# ---------------------------- main ---------------------------------------------------
if __name__ == "__main__":
    key = jax.random.PRNGKey(0)
    k_fea, k_par = jax.random.split(key)

    # fea: SEQ_LEN timestep features, each (BATCH, NODE_NUM)
    fea_keys = jax.random.split(k_fea, SEQ_LEN)
    fea_list = [jax.random.normal(k, (BATCH, NODE_NUM), jnp.float32) for k in fea_keys]

    params = init_params(k_par)
    param_slab = prepare_kernel_params(params)

    out = evolgcn_forward(param_slab, fea_list)
    out = jax.block_until_ready(out)
    assert out.shape == (1, NUM_CLASS), out.shape

    ref = evolgcn_reference(params, fea_list)
    assert jnp.allclose(out, ref, rtol=1e-4, atol=1e-4), (out, ref)
    print("KERNEL_OK")
</pallas_src>

<mosaic_0001>
module attributes {stable_mosaic.version = 11 : i64} {
  func.func @_evolgcn_fused_kernel(%arg0: memref<16x16xf32, #tpu.memory_space<vmem>>, %arg1: memref<280x256xf32, #tpu.memory_space<vmem>>, %arg2: memref<1x3xf32, #tpu.memory_space<vmem>>) attributes {dimension_semantics = [], scalar_prefetch = 0 : i64, scratch_operands = 0 : i64, tpu.core_type = #tpu.core_type<tc>} {
    %c0 = arith.constant 0 : index
    %c0_0 = arith.constant 0 : index
    %0 = vector.load %arg1[%c0, %c0_0] : memref<280x256xf32, #tpu.memory_space<vmem>>, vector<64x256xf32>
    %c64 = arith.constant 64 : index
    %c0_1 = arith.constant 0 : index
    %1 = vector.load %arg1[%c64, %c0_1] : memref<280x256xf32, #tpu.memory_space<vmem>>, vector<16x128xf32>
    %c80 = arith.constant 80 : index
    %c0_2 = arith.constant 0 : index
    %2 = vector.load %arg1[%c80, %c0_2] : memref<280x256xf32, #tpu.memory_space<vmem>>, vector<1x128xf32>
    %c88 = arith.constant 88 : index
    %c0_3 = arith.constant 0 : index
    %3 = vector.load %arg1[%c88, %c0_3] : memref<280x256xf32, #tpu.memory_space<vmem>>, vector<1x128xf32>
    %c96 = arith.constant 96 : index
    %c0_4 = arith.constant 0 : index
    %4 = vector.load %arg1[%c96, %c0_4] : memref<280x256xf32, #tpu.memory_space<vmem>>, vector<32x32xf32>
    %c128 = arith.constant 128 : index
    %c0_5 = arith.constant 0 : index
    %5 = vector.load %arg1[%c128, %c0_5] : memref<280x256xf32, #tpu.memory_space<vmem>>, vector<1x32xf32>
    %c136 = arith.constant 136 : index
    %c0_6 = arith.constant 0 : index
    %6 = vector.load %arg1[%c136, %c0_6] : memref<280x256xf32, #tpu.memory_space<vmem>>, vector<32x16xf32>
    %c168 = arith.constant 168 : index
    %c0_7 = arith.constant 0 : index
    %7 = vector.load %arg1[%c168, %c0_7] : memref<280x256xf32, #tpu.memory_space<vmem>>, vector<1x16xf32>
    %c176 = arith.constant 176 : index
    %c0_8 = arith.constant 0 : index
    %8 = vector.load %arg1[%c176, %c0_8] : memref<280x256xf32, #tpu.memory_space<vmem>>, vector<32x4xf32>
    %c208 = arith.constant 208 : index
    %c0_9 = arith.constant 0 : index
    %9 = vector.load %arg1[%c208, %c0_9] : memref<280x256xf32, #tpu.memory_space<vmem>>, vector<32x1xf32>
    %c240 = arith.constant 240 : index
    %c0_10 = arith.constant 0 : index
    %10 = vector.load %arg1[%c240, %c0_10] : memref<280x256xf32, #tpu.memory_space<vmem>>, vector<4x32xf32>
    %c248 = arith.constant 248 : index
    %c0_11 = arith.constant 0 : index
    %11 = vector.load %arg1[%c248, %c0_11] : memref<280x256xf32, #tpu.memory_space<vmem>>, vector<4x1xf32>
    %c256 = arith.constant 256 : index
    %c0_12 = arith.constant 0 : index
    %12 = vector.load %arg1[%c256, %c0_12] : memref<280x256xf32, #tpu.memory_space<vmem>>, vector<16x12xf32>
    %c272 = arith.constant 272 : index
    %c0_13 = arith.constant 0 : index
    %13 = vector.load %arg1[%c272, %c0_13] : memref<280x256xf32, #tpu.memory_space<vmem>>, vector<1x3xf32>
    %c0_14 = arith.constant 0 : index
    %c0_15 = arith.constant 0 : index
    %14 = vector.load %arg0[%c0_14, %c0_15] : memref<16x16xf32, #tpu.memory_space<vmem>>, vector<16x16xf32>
    %cst = arith.constant dense<0.000000e+00> : vector<16x128xf32>
    %15 = tpu.matmul %14, %1, %cst {dimension_numbers = #tpu.dot_dimension_numbers<[1], [0], [0], [1], [0, 0, 1, 1], [], []>} : vector<16x16xf32>, vector<16x128xf32>, vector<16x128xf32> -> vector<16x128xf32>
    %16 = vector.broadcast %2 : vector<1x128xf32> to vector<16x128xf32>
    %17 = arith.addf %15, %16 : vector<16x128xf32>
    %cst_16 = arith.constant 0.000000e+00 : f32
    %18 = vector.broadcast %cst_16 : f32 to vector<2x32xf32>
    %cst_17 = arith.constant 0.000000e+00 : f32
    %19 = vector.broadcast %cst_17 : f32 to vector<2x128xf32>
    %20 = vector.extract_strided_slice %17 {offsets = [0, 0], sizes = [2, 128], strides = [1, 1]} : vector<16x128xf32> to vector<2x128xf32>
    %21 = arith.addf %20, %19 : vector<2x128xf32>
    %22 = arith.negf %21 : vector<2x128xf32>
    %23 = math.exp %22 : vector<2x128xf32>
    %cst_18 = arith.constant 1.000000e+00 : f32
    %24 = vector.broadcast %cst_18 : f32 to vector<2x128xf32>
    %25 = arith.addf %24, %23 : vector<2x128xf32>
    %26 = arith.divf %24, %25 : vector<2x128xf32>
    %27 = math.tanh %21 : vector<2x128xf32>
    %28 = vector.extract_strided_slice %26 {offsets = [0, 0], sizes = [2, 32], strides = [1, 1]} : vector<2x128xf32> to vector<2x32xf32>
    %29 = vector.extract_strided_slice %26 {offsets = [0, 32], sizes = [2, 32], strides = [1, 1]} : vector<2x128xf32> to vector<2x32xf32>
    %30 = vector.extract_strided_slice %26 {offsets = [0, 96], sizes = [2, 32], strides = [1, 1]} : vector<2x128xf32> to vector<2x32xf32>
    %31 = vector.extract_strided_slice %27 {offsets = [0, 64], sizes = [2, 32], strides = [1, 1]} : vector<2x128xf32> to vector<2x32xf32>
    %32 = arith.mulf %29, %18 : vector<2x32xf32>
    %33 = arith.mulf %28, %31 : vector<2x32xf32>
    %34 = arith.addf %32, %33 : vector<2x32xf32>
    %35 = math.tanh %34 : vector<2x32xf32>
    %36 = arith.mulf %30, %35 : vector<2x32xf32>
    %37 = tpu.concatenate %36, %18 in 1 : vector<2x32xf32>, vector<2x32xf32> -> vector<2x64xf32>
    %cst_19 = arith.constant dense<0.000000e+00> : vector<2x256xf32>
    %38 = tpu.matmul %37, %0, %cst_19 {dimension_numbers = #tpu.dot_dimension_numbers<[1], [0], [0], [1], [0, 0, 1, 1], [], []>} : vector<2x64xf32>, vector<64x256xf32>, vector<2x256xf32> -> vector<2x256xf32>
    %39 = vector.extract_strided_slice %38 {offsets = [0, 0], sizes = [2, 128], strides = [1, 1]} : vector<2x256xf32> to vector<2x128xf32>
    %40 = vector.broadcast %3 : vector<1x128xf32> to vector<2x128xf32>
    %41 = arith.addf %39, %40 : vector<2x128xf32>
    %42 = vector.extract_strided_slice %38 {offsets = [0, 128], sizes = [2, 128], strides = [1, 1]} : vector<2x256xf32> to vector<2x128xf32>
    %43 = arith.negf %41 : vector<2x128xf32>
    %44 = math.exp %43 : vector<2x128xf32>
    %cst_20 = arith.constant 1.000000e+00 : f32
    %45 = vector.broadcast %cst_20 : f32 to vector<2x128xf32>
    %46 = arith.addf %45, %44 : vector<2x128xf32>
    %47 = arith.divf %45, %46 : vector<2x128xf32>
    %48 = math.tanh %41 : vector<2x128xf32>
    %49 = vector.extract_strided_slice %47 {offsets = [0, 0], sizes = [2, 32], strides = [1, 1]} : vector<2x128xf32> to vector<2x32xf32>
    %50 = vector.extract_strided_slice %47 {offsets = [0, 32], sizes = [2, 32], strides = [1, 1]} : vector<2x128xf32> to vector<2x32xf32>
    %51 = vector.extract_strided_slice %47 {offsets = [0, 96], sizes = [2, 32], strides = [1, 1]} : vector<2x128xf32> to vector<2x32xf32>
    %52 = vector.extract_strided_slice %48 {offsets = [0, 64], sizes = [2, 32], strides = [1, 1]} : vector<2x128xf32> to vector<2x32xf32>
    %53 = arith.mulf %50, %18 : vector<2x32xf32>
    %54 = arith.mulf %49, %52 : vector<2x32xf32>
    %55 = arith.addf %53, %54 : vector<2x32xf32>
    %56 = math.tanh %55 : vector<2x32xf32>
    %57 = arith.mulf %51, %56 : vector<2x32xf32>
    %58 = vector.extract_strided_slice %17 {offsets = [2, 0], sizes = [2, 128], strides = [1, 1]} : vector<16x128xf32> to vector<2x128xf32>
    %59 = arith.addf %58, %42 : vector<2x128xf32>
    %60 = arith.negf %59 : vector<2x128xf32>
    %61 = math.exp %60 : vector<2x128xf32>
    %cst_21 = arith.constant 1.000000e+00 : f32
    %62 = vector.broadcast %cst_21 : f32 to vector<2x128xf32>
    %63 = arith.addf %62, %61 : vector<2x128xf32>
    %64 = arith.divf %62, %63 : vector<2x128xf32>
    %65 = math.tanh %59 : vector<2x128xf32>
    %66 = vector.extract_strided_slice %64 {offsets = [0, 0], sizes = [2, 32], strides = [1, 1]} : vector<2x128xf32> to vector<2x32xf32>
    %67 = vector.extract_strided_slice %64 {offsets = [0, 32], sizes = [2, 32], strides = [1, 1]} : vector<2x128xf32> to vector<2x32xf32>
    %68 = vector.extract_strided_slice %64 {offsets = [0, 96], sizes = [2, 32], strides = [1, 1]} : vector<2x128xf32> to vector<2x32xf32>
    %69 = vector.extract_strided_slice %65 {offsets = [0, 64], sizes = [2, 32], strides = [1, 1]} : vector<2x128xf32> to vector<2x32xf32>
    %70 = arith.mulf %67, %34 : vector<2x32xf32>
    %71 = arith.mulf %66, %69 : vector<2x32xf32>
    %72 = arith.addf %70, %71 : vector<2x32xf32>
    %73 = math.tanh %72 : vector<2x32xf32>
    %74 = arith.mulf %68, %73 : vector<2x32xf32>
    %75 = tpu.concatenate %74, %57 in 1 : vector<2x32xf32>, vector<2x32xf32> -> vector<2x64xf32>
    %cst_22 = arith.constant dense<0.000000e+00> : vector<2x256xf32>
    %76 = tpu.matmul %75, %0, %cst_22 {dimension_numbers = #tpu.dot_dimension_numbers<[1], [0], [0], [1], [0, 0, 1, 1], [], []>} : vector<2x64xf32>, vector<64x256xf32>, vector<2x256xf32> -> vector<2x256xf32>
    %77 = vector.extract_strided_slice %76 {offsets = [0, 0], sizes = [2, 128], strides = [1, 1]} : vector<2x256xf32> to vector<2x128xf32>
    %78 = vector.broadcast %3 : vector<1x128xf32> to vector<2x128xf32>
    %79 = arith.addf %77, %78 : vector<2x128xf32>
    %80 = vector.extract_strided_slice %76 {offsets = [0, 128], sizes = [2, 128], strides = [1, 1]} : vector<2x256xf32> to vector<2x128xf32>
    %81 = arith.negf %79 : vector<2x128xf32>
    %82 = math.exp %81 : vector<2x128xf32>
    %cst_23 = arith.constant 1.000000e+00 : f32
    %83 = vector.broadcast %cst_23 : f32 to vector<2x128xf32>
    %84 = arith.addf %83, %82 : vector<2x128xf32>
    %85 = arith.divf %83, %84 : vector<2x128xf32>
    %86 = math.tanh %79 : vector<2x128xf32>
    %87 = vector.extract_strided_slice %85 {offsets = [0, 0], sizes = [2, 32], strides = [1, 1]} : vector<2x128xf32> to vector<2x32xf32>
    %88 = vector.extract_strided_slice %85 {offsets = [0, 32], sizes = [2, 32], strides = [1, 1]} : vector<2x128xf32> to vector<2x32xf32>
    %89 = vector.extract_strided_slice %85 {offsets = [0, 96], sizes = [2, 32], strides = [1, 1]} : vector<2x128xf32> to vector<2x32xf32>
    %90 = vector.extract_strided_slice %86 {offsets = [0, 64], sizes = [2, 32], strides = [1, 1]} : vector<2x128xf32> to vector<2x32xf32>
    %91 = arith.mulf %88, %55 : vector<2x32xf32>
    %92 = arith.mulf %87, %90 : vector<2x32xf32>
    %93 = arith.addf %91, %92 : vector<2x32xf32>
    %94 = math.tanh %93 : vector<2x32xf32>
    %95 = arith.mulf %89, %94 : vector<2x32xf32>
    %96 = vector.extract_strided_slice %17 {offsets = [4, 0], sizes = [2, 128], strides = [1, 1]} : vector<16x128xf32> to vector<2x128xf32>
    %97 = arith.addf %96, %80 : vector<2x128xf32>
    %98 = arith.negf %97 : vector<2x128xf32>
    %99 = math.exp %98 : vector<2x128xf32>
    %cst_24 = arith.constant 1.000000e+00 : f32
    %100 = vector.broadcast %cst_24 : f32 to vector<2x128xf32>
    %101 = arith.addf %100, %99 : vector<2x128xf32>
    %102 = arith.divf %100, %101 : vector<2x128xf32>
    %103 = math.tanh %97 : vector<2x128xf32>
    %104 = vector.extract_strided_slice %102 {offsets = [0, 0], sizes = [2, 32], strides = [1, 1]} : vector<2x128xf32> to vector<2x32xf32>
    %105 = vector.extract_strided_slice %102 {offsets = [0, 32], sizes = [2, 32], strides = [1, 1]} : vector<2x128xf32> to vector<2x32xf32>
    %106 = vector.extract_strided_slice %102 {offsets = [0, 96], sizes = [2, 32], strides = [1, 1]} : vector<2x128xf32> to vector<2x32xf32>
    %107 = vector.extract_strided_slice %103 {offsets = [0, 64], sizes = [2, 32], strides = [1, 1]} : vector<2x128xf32> to vector<2x32xf32>
    %108 = arith.mulf %105, %72 : vector<2x32xf32>
    %109 = arith.mulf %104, %107 : vector<2x32xf32>
    %110 = arith.addf %108, %109 : vector<2x32xf32>
    %111 = math.tanh %110 : vector<2x32xf32>
    %112 = arith.mulf %106, %111 : vector<2x32xf32>
    %113 = tpu.concatenate %112, %95 in 1 : vector<2x32xf32>, vector<2x32xf32> -> vector<2x64xf32>
    %cst_25 = arith.constant dense<0.000000e+00> : vector<2x256xf32>
    %114 = tpu.matmul %113, %0, %cst_25 {dimension_numbers = #tpu.dot_dimension_numbers<[1], [0], [0], [1], [0, 0, 1, 1], [], []>} : vector<2x64xf32>, vector<64x256xf32>, vector<2x256xf32> -> vector<2x256xf32>
    %115 = vector.extract_strided_slice %114 {offsets = [0, 0], sizes = [2, 128], strides = [1, 1]} : vector<2x256xf32> to vector<2x128xf32>
    %116 = vector.broadcast %3 : vector<1x128xf32> to vector<2x128xf32>
    %117 = arith.addf %115, %116 : vector<2x128xf32>
    %118 = vector.extract_strided_slice %114 {offsets = [0, 128], sizes = [2, 128], strides = [1, 1]} : vector<2x256xf32> to vector<2x128xf32>
    %119 = arith.negf %117 : vector<2x128xf32>
    %120 = math.exp %119 : vector<2x128xf32>
    %cst_26 = arith.constant 1.000000e+00 : f32
    %121 = vector.broadcast %cst_26 : f32 to vector<2x128xf32>
    %122 = arith.addf %121, %120 : vector<2x128xf32>
    %123 = arith.divf %121, %122 : vector<2x128xf32>
    %124 = math.tanh %117 : vector<2x128xf32>
    %125 = vector.extract_strided_slice %123 {offsets = [0, 0], sizes = [2, 32], strides = [1, 1]} : vector<2x128xf32> to vector<2x32xf32>
    %126 = vector.extract_strided_slice %123 {offsets = [0, 32], sizes = [2, 32], strides = [1, 1]} : vector<2x128xf32> to vector<2x32xf32>
    %127 = vector.extract_strided_slice %123 {offsets = [0, 96], sizes = [2, 32], strides = [1, 1]} : vector<2x128xf32> to vector<2x32xf32>
    %128 = vector.extract_strided_slice %124 {offsets = [0, 64], sizes = [2, 32], strides = [1, 1]} : vector<2x128xf32> to vector<2x32xf32>
    %129 = arith.mulf %126, %93 : vector<2x32xf32>
    %130 = arith.mulf %125, %128 : vector<2x32xf32>
    %131 = arith.addf %129, %130 : vector<2x32xf32>
    %132 = math.tanh %131 : vector<2x32xf32>
    %133 = arith.mulf %127, %132 : vector<2x32xf32>
    %134 = vector.extract_strided_slice %17 {offsets = [6, 0], sizes = [2, 128], strides = [1, 1]} : vector<16x128xf32> to vector<2x128xf32>
    %135 = arith.addf %134, %118 : vector<2x128xf32>
    %136 = arith.negf %135 : vector<2x128xf32>
    %137 = math.exp %136 : vector<2x128xf32>
    %cst_27 = arith.constant 1.000000e+00 : f32
    %138 = vector.broadcast %cst_27 : f32 to vector<2x128xf32>
    %139 = arith.addf %138, %137 : vector<2x128xf32>
    %140 = arith.divf %138, %139 : vector<2x128xf32>
    %141 = math.tanh %135 : vector<2x128xf32>
    %142 = vector.extract_strided_slice %140 {offsets = [0, 0], sizes = [2, 32], strides = [1, 1]} : vector<2x128xf32> to vector<2x32xf32>
    %143 = vector.extract_strided_slice %140 {offsets = [0, 32], sizes = [2, 32], strides = [1, 1]} : vector<2x128xf32> to vector<2x32xf32>
    %144 = vector.extract_strided_slice %140 {offsets = [0, 96], sizes = [2, 32], strides = [1, 1]} : vector<2x128xf32> to vector<2x32xf32>
    %145 = vector.extract_strided_slice %141 {offsets = [0, 64], sizes = [2, 32], strides = [1, 1]} : vector<2x128xf32> to vector<2x32xf32>
    %146 = arith.mulf %143, %110 : vector<2x32xf32>
    %147 = arith.mulf %142, %145 : vector<2x32xf32>
    %148 = arith.addf %146, %147 : vector<2x32xf32>
    %149 = math.tanh %148 : vector<2x32xf32>
    %150 = arith.mulf %144, %149 : vector<2x32xf32>
    %151 = tpu.concatenate %150, %133 in 1 : vector<2x32xf32>, vector<2x32xf32> -> vector<2x64xf32>
    %cst_28 = arith.constant dense<0.000000e+00> : vector<2x256xf32>
    %152 = tpu.matmul %151, %0, %cst_28 {dimension_numbers = #tpu.dot_dimension_numbers<[1], [0], [0], [1], [0, 0, 1, 1], [], []>} : vector<2x64xf32>, vector<64x256xf32>, vector<2x256xf32> -> vector<2x256xf32>
    %153 = vector.extract_strided_slice %152 {offsets = [0, 0], sizes = [2, 128], strides = [1, 1]} : vector<2x256xf32> to vector<2x128xf32>
    %154 = vector.broadcast %3 : vector<1x128xf32> to vector<2x128xf32>
    %155 = arith.addf %153, %154 : vector<2x128xf32>
    %156 = vector.extract_strided_slice %152 {offsets = [0, 128], sizes = [2, 128], strides = [1, 1]} : vector<2x256xf32> to vector<2x128xf32>
    %157 = arith.negf %155 : vector<2x128xf32>
    %158 = math.exp %157 : vector<2x128xf32>
    %cst_29 = arith.constant 1.000000e+00 : f32
    %159 = vector.broadcast %cst_29 : f32 to vector<2x128xf32>
    %160 = arith.addf %159, %158 : vector<2x128xf32>
    %161 = arith.divf %159, %160 : vector<2x128xf32>
    %162 = math.tanh %155 : vector<2x128xf32>
    %163 = vector.extract_strided_slice %161 {offsets = [0, 0], sizes = [2, 32], strides = [1, 1]} : vector<2x128xf32> to vector<2x32xf32>
    %164 = vector.extract_strided_slice %161 {offsets = [0, 32], sizes = [2, 32], strides = [1, 1]} : vector<2x128xf32> to vector<2x32xf32>
    %165 = vector.extract_strided_slice %161 {offsets = [0, 96], sizes = [2, 32], strides = [1, 1]} : vector<2x128xf32> to vector<2x32xf32>
    %166 = vector.extract_strided_slice %162 {offsets = [0, 64], sizes = [2, 32], strides = [1, 1]} : vector<2x128xf32> to vector<2x32xf32>
    %167 = arith.mulf %164, %131 : vector<2x32xf32>
    %168 = arith.mulf %163, %166 : vector<2x32xf32>
    %169 = arith.addf %167, %168 : vector<2x32xf32>
    %170 = math.tanh %169 : vector<2x32xf32>
    %171 = arith.mulf %165, %170 : vector<2x32xf32>
    %172 = vector.extract_strided_slice %17 {offsets = [8, 0], sizes = [2, 128], strides = [1, 1]} : vector<16x128xf32> to vector<2x128xf32>
    %173 = arith.addf %172, %156 : vector<2x128xf32>
    %174 = arith.negf %173 : vector<2x128xf32>
    %175 = math.exp %174 : vector<2x128xf32>
    %cst_30 = arith.constant 1.000000e+00 : f32
    %176 = vector.broadcast %cst_30 : f32 to vector<2x128xf32>
    %177 = arith.addf %176, %175 : vector<2x128xf32>
    %178 = arith.divf %176, %177 : vector<2x128xf32>
    %179 = math.tanh %173 : vector<2x128xf32>
    %180 = vector.extract_strided_slice %178 {offsets = [0, 0], sizes = [2, 32], strides = [1, 1]} : vector<2x128xf32> to vector<2x32xf32>
    %181 = vector.extract_strided_slice %178 {offsets = [0, 32], sizes = [2, 32], strides = [1, 1]} : vector<2x128xf32> to vector<2x32xf32>
    %182 = vector.extract_strided_slice %178 {offsets = [0, 96], sizes = [2, 32], strides = [1, 1]} : vector<2x128xf32> to vector<2x32xf32>
    %183 = vector.extract_strided_slice %179 {offsets = [0, 64], sizes = [2, 32], strides = [1, 1]} : vector<2x128xf32> to vector<2x32xf32>
    %184 = arith.mulf %181, %148 : vector<2x32xf32>
    %185 = arith.mulf %180, %183 : vector<2x32xf32>
    %186 = arith.addf %184, %185 : vector<2x32xf32>
    %187 = math.tanh %186 : vector<2x32xf32>
    %188 = arith.mulf %182, %187 : vector<2x32xf32>
    %189 = tpu.concatenate %188, %171 in 1 : vector<2x32xf32>, vector<2x32xf32> -> vector<2x64xf32>
    %cst_31 = arith.constant dense<0.000000e+00> : vector<2x256xf32>
    %190 = tpu.matmul %189, %0, %cst_31 {dimension_numbers = #tpu.dot_dimension_numbers<[1], [0], [0], [1], [0, 0, 1, 1], [], []>} : vector<2x64xf32>, vector<64x256xf32>, vector<2x256xf32> -> vector<2x256xf32>
    %191 = vector.extract_strided_slice %190 {offsets = [0, 0], sizes = [2, 128], strides = [1, 1]} : vector<2x256xf32> to vector<2x128xf32>
    %192 = vector.broadcast %3 : vector<1x128xf32> to vector<2x128xf32>
    %193 = arith.addf %191, %192 : vector<2x128xf32>
    %194 = vector.extract_strided_slice %190 {offsets = [0, 128], sizes = [2, 128], strides = [1, 1]} : vector<2x256xf32> to vector<2x128xf32>
    %195 = arith.negf %193 : vector<2x128xf32>
    %196 = math.exp %195 : vector<2x128xf32>
    %cst_32 = arith.constant 1.000000e+00 : f32
    %197 = vector.broadcast %cst_32 : f32 to vector<2x128xf32>
    %198 = arith.addf %197, %196 : vector<2x128xf32>
    %199 = arith.divf %197, %198 : vector<2x128xf32>
    %200 = math.tanh %193 : vector<2x128xf32>
    %201 = vector.extract_strided_slice %199 {offsets = [0, 0], sizes = [2, 32], strides = [1, 1]} : vector<2x128xf32> to vector<2x32xf32>
    %202 = vector.extract_strided_slice %199 {offsets = [0, 32], sizes = [2, 32], strides = [1, 1]} : vector<2x128xf32> to vector<2x32xf32>
    %203 = vector.extract_strided_slice %199 {offsets = [0, 96], sizes = [2, 32], strides = [1, 1]} : vector<2x128xf32> to vector<2x32xf32>
    %204 = vector.extract_strided_slice %200 {offsets = [0, 64], sizes = [2, 32], strides = [1, 1]} : vector<2x128xf32> to vector<2x32xf32>
    %205 = arith.mulf %202, %169 : vector<2x32xf32>
    %206 = arith.mulf %201, %204 : vector<2x32xf32>
    %207 = arith.addf %205, %206 : vector<2x32xf32>
    %208 = math.tanh %207 : vector<2x32xf32>
    %209 = arith.mulf %203, %208 : vector<2x32xf32>
    %210 = vector.extract_strided_slice %17 {offsets = [10, 0], sizes = [2, 128], strides = [1, 1]} : vector<16x128xf32> to vector<2x128xf32>
    %211 = arith.addf %210, %194 : vector<2x128xf32>
    %212 = arith.negf %211 : vector<2x128xf32>
    %213 = math.exp %212 : vector<2x128xf32>
    %cst_33 = arith.constant 1.000000e+00 : f32
    %214 = vector.broadcast %cst_33 : f32 to vector<2x128xf32>
    %215 = arith.addf %214, %213 : vector<2x128xf32>
    %216 = arith.divf %214, %215 : vector<2x128xf32>
    %217 = math.tanh %211 : vector<2x128xf32>
    %218 = vector.extract_strided_slice %216 {offsets = [0, 0], sizes = [2, 32], strides = [1, 1]} : vector<2x128xf32> to vector<2x32xf32>
    %219 = vector.extract_strided_slice %216 {offsets = [0, 32], sizes = [2, 32], strides = [1, 1]} : vector<2x128xf32> to vector<2x32xf32>
    %220 = vector.extract_strided_slice %216 {offsets = [0, 96], sizes = [2, 32], strides = [1, 1]} : vector<2x128xf32> to vector<2x32xf32>
    %221 = vector.extract_strided_slice %217 {offsets = [0, 64], sizes = [2, 32], strides = [1, 1]} : vector<2x128xf32> to vector<2x32xf32>
    %222 = arith.mulf %219, %186 : vector<2x32xf32>
    %223 = arith.mulf %218, %221 : vector<2x32xf32>
    %224 = arith.addf %222, %223 : vector<2x32xf32>
    %225 = math.tanh %224 : vector<2x32xf32>
    %226 = arith.mulf %220, %225 : vector<2x32xf32>
    %227 = tpu.concatenate %226, %209 in 1 : vector<2x32xf32>, vector<2x32xf32> -> vector<2x64xf32>
    %cst_34 = arith.constant dense<0.000000e+00> : vector<2x256xf32>
    %228 = tpu.matmul %227, %0, %cst_34 {dimension_numbers = #tpu.dot_dimension_numbers<[1], [0], [0], [1], [0, 0, 1, 1], [], []>} : vector<2x64xf32>, vector<64x256xf32>, vector<2x256xf32> -> vector<2x256xf32>
    %229 = vector.extract_strided_slice %228 {offsets = [0, 0], sizes = [2, 128], strides = [1, 1]} : vector<2x256xf32> to vector<2x128xf32>
    %230 = vector.broadcast %3 : vector<1x128xf32> to vector<2x128xf32>
    %231 = arith.addf %229, %230 : vector<2x128xf32>
    %232 = vector.extract_strided_slice %228 {offsets = [0, 128], sizes = [2, 128], strides = [1, 1]} : vector<2x256xf32> to vector<2x128xf32>
    %233 = arith.negf %231 : vector<2x128xf32>
    %234 = math.exp %233 : vector<2x128xf32>
    %cst_35 = arith.constant 1.000000e+00 : f32
    %235 = vector.broadcast %cst_35 : f32 to vector<2x128xf32>
    %236 = arith.addf %235, %234 : vector<2x128xf32>
    %237 = arith.divf %235, %236 : vector<2x128xf32>
    %238 = math.tanh %231 : vector<2x128xf32>
    %239 = vector.extract_strided_slice %237 {offsets = [0, 0], sizes = [2, 32], strides = [1, 1]} : vector<2x128xf32> to vector<2x32xf32>
    %240 = vector.extract_strided_slice %237 {offsets = [0, 32], sizes = [2, 32], strides = [1, 1]} : vector<2x128xf32> to vector<2x32xf32>
    %241 = vector.extract_strided_slice %237 {offsets = [0, 96], sizes = [2, 32], strides = [1, 1]} : vector<2x128xf32> to vector<2x32xf32>
    %242 = vector.extract_strided_slice %238 {offsets = [0, 64], sizes = [2, 32], strides = [1, 1]} : vector<2x128xf32> to vector<2x32xf32>
    %243 = arith.mulf %240, %207 : vector<2x32xf32>
    %244 = arith.mulf %239, %242 : vector<2x32xf32>
    %245 = arith.addf %243, %244 : vector<2x32xf32>
    %246 = math.tanh %245 : vector<2x32xf32>
    %247 = arith.mulf %241, %246 : vector<2x32xf32>
    %248 = vector.extract_strided_slice %17 {offsets = [12, 0], sizes = [2, 128], strides = [1, 1]} : vector<16x128xf32> to vector<2x128xf32>
    %249 = arith.addf %248, %232 : vector<2x128xf32>
    %250 = arith.negf %249 : vector<2x128xf32>
    %251 = math.exp %250 : vector<2x128xf32>
    %cst_36 = arith.constant 1.000000e+00 : f32
    %252 = vector.broadcast %cst_36 : f32 to vector<2x128xf32>
    %253 = arith.addf %252, %251 : vector<2x128xf32>
    %254 = arith.divf %252, %253 : vector<2x128xf32>
    %255 = math.tanh %249 : vector<2x128xf32>
    %256 = vector.extract_strided_slice %254 {offsets = [0, 0], sizes = [2, 32], strides = [1, 1]} : vector<2x128xf32> to vector<2x32xf32>
    %257 = vector.extract_strided_slice %254 {offsets = [0, 32], sizes = [2, 32], strides = [1, 1]} : vector<2x128xf32> to vector<2x32xf32>
    %258 = vector.extract_strided_slice %254 {offsets = [0, 96], sizes = [2, 32], strides = [1, 1]} : vector<2x128xf32> to vector<2x32xf32>
    %259 = vector.extract_strided_slice %255 {offsets = [0, 64], sizes = [2, 32], strides = [1, 1]} : vector<2x128xf32> to vector<2x32xf32>
    %260 = arith.mulf %257, %224 : vector<2x32xf32>
    %261 = arith.mulf %256, %259 : vector<2x32xf32>
    %262 = arith.addf %260, %261 : vector<2x32xf32>
    %263 = math.tanh %262 : vector<2x32xf32>
    %264 = arith.mulf %258, %263 : vector<2x32xf32>
    %265 = tpu.concatenate %264, %247 in 1 : vector<2x32xf32>, vector<2x32xf32> -> vector<2x64xf32>
    %cst_37 = arith.constant dense<0.000000e+00> : vector<2x256xf32>
    %266 = tpu.matmul %265, %0, %cst_37 {dimension_numbers = #tpu.dot_dimension_numbers<[1], [0], [0], [1], [0, 0, 1, 1], [], []>} : vector<2x64xf32>, vector<64x256xf32>, vector<2x256xf32> -> vector<2x256xf32>
    %267 = vector.extract_strided_slice %266 {offsets = [0, 0], sizes = [2, 128], strides = [1, 1]} : vector<2x256xf32> to vector<2x128xf32>
    %268 = vector.broadcast %3 : vector<1x128xf32> to vector<2x128xf32>
    %269 = arith.addf %267, %268 : vector<2x128xf32>
    %270 = vector.extract_strided_slice %266 {offsets = [0, 128], sizes = [2, 128], strides = [1, 1]} : vector<2x256xf32> to vector<2x128xf32>
    %271 = arith.negf %269 : vector<2x128xf32>
    %272 = math.exp %271 : vector<2x128xf32>
    %cst_38 = arith.constant 1.000000e+00 : f32
    %273 = vector.broadcast %cst_38 : f32 to vector<2x128xf32>
    %274 = arith.addf %273, %272 : vector<2x128xf32>
    %275 = arith.divf %273, %274 : vector<2x128xf32>
    %276 = math.tanh %269 : vector<2x128xf32>
    %277 = vector.extract_strided_slice %275 {offsets = [0, 0], sizes = [2, 32], strides = [1, 1]} : vector<2x128xf32> to vector<2x32xf32>
    %278 = vector.extract_strided_slice %275 {offsets = [0, 32], sizes = [2, 32], strides = [1, 1]} : vector<2x128xf32> to vector<2x32xf32>
    %279 = vector.extract_strided_slice %275 {offsets = [0, 96], sizes = [2, 32], strides = [1, 1]} : vector<2x128xf32> to vector<2x32xf32>
    %280 = vector.extract_strided_slice %276 {offsets = [0, 64], sizes = [2, 32], strides = [1, 1]} : vector<2x128xf32> to vector<2x32xf32>
    %281 = arith.mulf %278, %245 : vector<2x32xf32>
    %282 = arith.mulf %277, %280 : vector<2x32xf32>
    %283 = arith.addf %281, %282 : vector<2x32xf32>
    %284 = math.tanh %283 : vector<2x32xf32>
    %285 = arith.mulf %279, %284 : vector<2x32xf32>
    %286 = vector.extract_strided_slice %17 {offsets = [14, 0], sizes = [2, 128], strides = [1, 1]} : vector<16x128xf32> to vector<2x128xf32>
    %287 = arith.addf %286, %270 : vector<2x128xf32>
    %288 = arith.negf %287 : vector<2x128xf32>
    %289 = math.exp %288 : vector<2x128xf32>
    %cst_39 = arith.constant 1.000000e+00 : f32
    %290 = vector.broadcast %cst_39 : f32 to vector<2x128xf32>
    %291 = arith.addf %290, %289 : vector<2x128xf32>
    %292 = arith.divf %290, %291 : vector<2x128xf32>
    %293 = math.tanh %287 : vector<2x128xf32>
    %294 = vector.extract_strided_slice %292 {offsets = [0, 0], sizes = [2, 32], strides = [1, 1]} : vector<2x128xf32> to vector<2x32xf32>
    %295 = vector.extract_strided_slice %292 {offsets = [0, 32], sizes = [2, 32], strides = [1, 1]} : vector<2x128xf32> to vector<2x32xf32>
    %296 = vector.extract_strided_slice %292 {offsets = [0, 96], sizes = [2, 32], strides = [1, 1]} : vector<2x128xf32> to vector<2x32xf32>
    %297 = vector.extract_strided_slice %293 {offsets = [0, 64], sizes = [2, 32], strides = [1, 1]} : vector<2x128xf32> to vector<2x32xf32>
    %298 = arith.mulf %295, %262 : vector<2x32xf32>
    %299 = arith.mulf %294, %297 : vector<2x32xf32>
    %300 = arith.addf %298, %299 : vector<2x32xf32>
    %301 = math.tanh %300 : vector<2x32xf32>
    %302 = arith.mulf %296, %301 : vector<2x32xf32>
    %303 = tpu.concatenate %302, %285 in 1 : vector<2x32xf32>, vector<2x32xf32> -> vector<2x64xf32>
    %cst_40 = arith.constant dense<0.000000e+00> : vector<2x256xf32>
    %304 = tpu.matmul %303, %0, %cst_40 {dimension_numbers = #tpu.dot_dimension_numbers<[1], [0], [0], [1], [0, 0, 1, 1], [], []>} : vector<2x64xf32>, vector<64x256xf32>, vector<2x256xf32> -> vector<2x256xf32>
    %305 = vector.extract_strided_slice %304 {offsets = [0, 0], sizes = [2, 128], strides = [1, 1]} : vector<2x256xf32> to vector<2x128xf32>
    %306 = vector.broadcast %3 : vector<1x128xf32> to vector<2x128xf32>
    %307 = arith.addf %305, %306 : vector<2x128xf32>
    %308 = arith.negf %307 : vector<2x128xf32>
    %309 = math.exp %308 : vector<2x128xf32>
    %cst_41 = arith.constant 1.000000e+00 : f32
    %310 = vector.broadcast %cst_41 : f32 to vector<2x128xf32>
    %311 = arith.addf %310, %309 : vector<2x128xf32>
    %312 = arith.divf %310, %311 : vector<2x128xf32>
    %313 = math.tanh %307 : vector<2x128xf32>
    %314 = vector.extract_strided_slice %312 {offsets = [0, 0], sizes = [2, 32], strides = [1, 1]} : vector<2x128xf32> to vector<2x32xf32>
    %315 = vector.extract_strided_slice %312 {offsets = [0, 32], sizes = [2, 32], strides = [1, 1]} : vector<2x128xf32> to vector<2x32xf32>
    %316 = vector.extract_strided_slice %312 {offsets = [0, 96], sizes = [2, 32], strides = [1, 1]} : vector<2x128xf32> to vector<2x32xf32>
    %317 = vector.extract_strided_slice %313 {offsets = [0, 64], sizes = [2, 32], strides = [1, 1]} : vector<2x128xf32> to vector<2x32xf32>
    %318 = arith.mulf %315, %283 : vector<2x32xf32>
    %319 = arith.mulf %314, %317 : vector<2x32xf32>
    %320 = arith.addf %318, %319 : vector<2x32xf32>
    %321 = math.tanh %320 : vector<2x32xf32>
    %322 = arith.mulf %316, %321 : vector<2x32xf32>
    %323 = tpu.concatenate %302, %322 in 0 : vector<2x32xf32>, vector<2x32xf32> -> vector<4x32xf32>
    %cst_42 = arith.constant dense<0.000000e+00> : vector<4x32xf32>
    %324 = tpu.matmul %323, %4, %cst_42 {dimension_numbers = #tpu.dot_dimension_numbers<[1], [0], [0], [1], [0, 0, 1, 1], [], []>} : vector<4x32xf32>, vector<32x32xf32>, vector<4x32xf32> -> vector<4x32xf32>
    %325 = vector.broadcast %5 : vector<1x32xf32> to vector<4x32xf32>
    %326 = arith.addf %324, %325 : vector<4x32xf32>
    %cst_43 = arith.constant 0.000000e+00 : f32
    %327 = vector.broadcast %cst_43 : f32 to vector<4x32xf32>
    %328 = arith.maximumf %326, %327 : vector<4x32xf32>
    %cst_44 = arith.constant dense<0.000000e+00> : vector<4x16xf32>
    %329 = tpu.matmul %328, %6, %cst_44 {dimension_numbers = #tpu.dot_dimension_numbers<[1], [0], [0], [1], [0, 0, 1, 1], [], []>} : vector<4x32xf32>, vector<32x16xf32>, vector<4x16xf32> -> vector<4x16xf32>
    %330 = vector.broadcast %7 : vector<1x16xf32> to vector<4x16xf32>
    %331 = arith.addf %329, %330 : vector<4x16xf32>
    %cst_45 = arith.constant dense<0.000000e+00> : vector<32x16xf32>
    %332 = tpu.matmul %8, %331, %cst_45 {dimension_numbers = #tpu.dot_dimension_numbers<[1], [0], [0], [1], [0, 0, 1, 1], [], []>} : vector<32x4xf32>, vector<4x16xf32>, vector<32x16xf32> -> vector<32x16xf32>
    %333 = vector.broadcast %9 : vector<32x1xf32> to vector<32x16xf32>
    %334 = arith.addf %332, %333 : vector<32x16xf32>
    %cst_46 = arith.constant 0.000000e+00 : f32
    %335 = vector.broadcast %cst_46 : f32 to vector<32x16xf32>
    %336 = arith.maximumf %334, %335 : vector<32x16xf32>
    %cst_47 = arith.constant dense<0.000000e+00> : vector<4x16xf32>
    %337 = tpu.matmul %10, %336, %cst_47 {dimension_numbers = #tpu.dot_dimension_numbers<[1], [0], [0], [1], [0, 0, 1, 1], [], []>} : vector<4x32xf32>, vector<32x16xf32>, vector<4x16xf32> -> vector<4x16xf32>
    %338 = vector.broadcast %11 : vector<4x1xf32> to vector<4x16xf32>
    %339 = arith.addf %337, %338 : vector<4x16xf32>
    %cst_48 = arith.constant dense<0.000000e+00> : vector<4x12xf32>
    %340 = tpu.matmul %339, %12, %cst_48 {dimension_numbers = #tpu.dot_dimension_numbers<[1], [0], [0], [1], [0, 0, 1, 1], [], []>} : vector<4x16xf32>, vector<16x12xf32>, vector<4x12xf32> -> vector<4x12xf32>
    %341 = vector.extract_strided_slice %340 {offsets = [0, 0], sizes = [1, 3], strides = [1, 1]} : vector<4x12xf32> to vector<1x3xf32>
    %342 = arith.addf %13, %341 : vector<1x3xf32>
    %343 = vector.extract_strided_slice %340 {offsets = [1, 3], sizes = [1, 3], strides = [1, 1]} : vector<4x12xf32> to vector<1x3xf32>
    %344 = arith.addf %342, %343 : vector<1x3xf32>
    %345 = vector.extract_strided_slice %340 {offsets = [2, 6], sizes = [1, 3], strides = [1, 1]} : vector<4x12xf32> to vector<1x3xf32>
    %346 = arith.addf %344, %345 : vector<1x3xf32>
    %347 = vector.extract_strided_slice %340 {offsets = [3, 9], sizes = [1, 3], strides = [1, 1]} : vector<4x12xf32> to vector<1x3xf32>
    %348 = arith.addf %346, %347 : vector<1x3xf32>
    %c0_49 = arith.constant 0 : index
    %c0_50 = arith.constant 0 : index
    %349 = vector.load %arg2[%c0_49, %c0_50] : memref<1x3xf32, #tpu.memory_space<vmem>>, vector<1x3xf32>
    tpu.vector_store %arg2[%c0_49, %c0_50], %348 {strides = array<i32>} : memref<1x3xf32, #tpu.memory_space<vmem>>, vector<1x3xf32>,
    return
  }
}

</mosaic_0001>

<bundles_post_ra>
// kernel: tpu_custom_call.1
= control target key start
LH: loop header
LB: loop body
LE: loop exit
PB: predicated region body
PF: predicated region fallthrough
CT: control target
= control target key end

     0   :  { %7 = vsyncpa [#allocation3], 0  ;;  %s2522_s0 = inlined_call_operand.hbm [shape: f32[16,16], index: 0, kind: input, shape index: {}]   ;;  %s2523_s1 = inlined_call_operand.hbm [shape: f32[280,256], index: 1, kind: input, shape index: {}]   ;;  %s2524_s2 = inlined_call_operand.hbm [shape: f32[1,3], index: 2, kind: output, shape index: {}]  }
   0x1   :  { %8 = vsyncpa [#allocation6], 0 }
   0x2   :  { %9 = vsyncpa [#allocation4], 0  ;;  %s2235_s9 = smov [#allocation2]   ;;  %s2163_s13 = scalar_lea.hbm %s2522_s0, 256 }
   0x3   :  { %s15_s10 = sshll.u32 %s2235_s9, 4  ;;  %p2164_p0 = scmp.ne.s32.totalorder %s2522_s0, %s2163_s13  ;;  %s16_s10 = int_to_ptr.vmem [resolvable:$true] %s15_s10 }
   0x4   :  { %p2167_p1 = scmp.lt.u32.totalorder %s2163_s13, %s2522_s0 }
   0x6   :  { %p2169_p2 = pnand %p2167_p1, %p2164_p0 }
   0x8   :  { %2172 = shalt.err (!%p2169_p2)
}
   0x9   :  { %s2173_s18 = scalar_lea.vmem %s16_s10, 256  ;;  %p2178_p4 = scmp.lt.s32.totalorder %s16_s10, %s16_s10 }
   0xa   :  { %p2174_p3 = scmp.ne.s32.totalorder %s16_s10, %s2173_s18  ;;  %p2179_p5 = scmp.lt.s32.totalorder %s2173_s18, %s2173_s18 }
   0xc   :  { %p2180_p6 = por %p2179_p5, %p2178_p4 }
   0xe   :  { %p2181_p7 = pnand %p2180_p6, %p2174_p3 }
  0x10   :  { %2184 = shalt.err (!%p2181_p7)
}
  0x11   :  { %s2236_s19 = smov 128   ;;  %s2237_s20 = smov 8  }
  0x12   :  { %21 = dma.hbm_to_vmem [thread:$0]  %s2522_s0, 256, %s16_s10, [#allocation3], %s2236_s19, %s2236_s19, %s2237_s20  }
  0x13   :  { %s2238_s23 = smov [#allocation5]   ;;  %s2185_s27 = scalar_lea.hbm %s2523_s1, 8960 }
  0x14   :  { %s27_s24 = sshll.u32 %s2238_s23, 4  ;;  %p2186_p8 = scmp.ne.s32.totalorder %s2523_s1, %s2185_s27  ;;  %s28_s24 = int_to_ptr.vmem [resolvable:$true] %s27_s24 }
  0x15   :  { %p2189_p9 = scmp.lt.u32.totalorder %s2185_s27, %s2523_s1 }
  0x17   :  { %p2191_p10 = pnand %p2189_p9, %p2186_p8 }
  0x19   :  { %2194 = shalt.err (!%p2191_p10)
}
  0x1a   :  { %s2195_s4 = scalar_lea.vmem %s28_s24, 8960  ;;  %p2200_p12 = scmp.lt.s32.totalorder %s28_s24, %s28_s24 }
  0x1b   :  { %p2196_p11 = scmp.ne.s32.totalorder %s28_s24, %s2195_s4  ;;  %p2201_p13 = scmp.lt.s32.totalorder %s2195_s4, %s2195_s4 }
  0x1d   :  { %p2202_p0 = por %p2201_p13, %p2200_p12 }
  0x1f   :  { %p2203_p1 = pnand %p2202_p0, %p2196_p11 }
  0x21   :  { %2206 = shalt.err (!%p2203_p1)
}
  0x22   :  { %s2239_s0 = smov 256   ;;  %s2240_s5 = smov 16  }
  0x23   :  { %33 = dma.hbm_to_vmem [thread:$0]  %s2523_s1, 8960, %s28_s24, [#allocation6], %s2239_s0, %s2239_s0, %s2240_s5  }
  0x24   :  { %2229 = dma.done.wait [#allocation3], 256  }
  0x25   :  { %2230 = vsyncadd [#allocation3], 4294967040 }
  0x26   :  { %2231 = dma.done.wait [#allocation6], 8960  }
  0x27   :  { %2232 = vsyncadd [#allocation6], 4294958336  ;;  %vm85_vm0 = vcmask 130048   ;;  %v56_v0 = vld [vmem:[#allocation5 + $0x80] sm:$0xff]  ;;  %v57_v1 = vld [vmem:[#allocation5 + $0x90] sm:$0xff]  ;;  %s2241_s1 = smov 64  }
  0x28   :  { %v83_v2 = vld [vmem:[#allocation2] sm:$0xff]  ;;  %v1864_v3 = vpack.c.bf16 %v57_v1, %v56_v0  ;;  %v84_v4 = vld [vmem:[#allocation2 + $0x8] sm:$0xff]  ;;  %v58_v5 = vld [vmem:[#allocation5 + $0xa0] ss:$0 sm:$0xff]  ;;  %s2242_s8 = smov 32   ;;  %v2243_v45 = vmov 0.0  }
  0x29   :  { %1813 = vmatprep.mubr.msk.f32.mxu0 %vm85_vm0, %v83_v2  ;;  %v41_v20 = vld [vmem:[#allocation5 + $0x8] sm:$0xff]  ;;  %v43_v21 = vld [vmem:[#allocation5 + $0x18] sm:$0xff]  ;;  %v40_v22 = vld [vmem:[#allocation5] sm:$0xff]  ;;  %266 = vmatprep.mubr.f32.mxu1 %v2243_v45  ;;  %vm196_vm1 = vcmask 261120   ;;  %vm198_vm2 = vcmask 523264   ;;  %vm2245_vm3 = vmmov 0  }
  0x2a   :  { %1865 = vmatprep.subr.bf16.mxu0 %v1864_v3  ;;  %v2303_v23 = vpack.c.bf16 %v43_v21, %v41_v20  ;;  %v42_v24 = vld [vmem:[#allocation5 + $0x10] sm:$0xff]  ;;  %v45_v25 = vld [vmem:[#allocation5 + $0x28] sm:$0xff]  ;;  %v47_v26 = vld [vmem:[#allocation5 + $0x38] sm:$0xff]  ;;  %vm1284_vm4 = vcmask 1041408   ;;  %vm1455_vm5 = vcmask 31744   ;;  %vm1468_vm6 = vcmask 1043456  }
  0x2b   :  { %1867 = vmatpush3.bf16.msra.mxu0 %v1864_v3  ;;  %v2305_v27 = vpack.c.bf16 %v42_v24, %v40_v22  ;;  %v2307_v28 = vpack.c.bf16 %v47_v26, %v45_v25  ;;  %v44_v29 = vld [vmem:[#allocation5 + $0x20] sm:$0xff]  ;;  %v46_v30 = vld [vmem:[#allocation5 + $0x30] sm:$0xff]  ;;  %v49_v31 = vld [vmem:[#allocation5 + $0x48] sm:$0xff]  ;;  %s2247_s9 = smov 122   ;;  %s2248_s10 = smov 125   ;;  %vm1729_vm7 = vcmask 16384  }
  0x2c   :  { %1869 = vmatprep.subr.bf16.mxu1 %v2303_v23  ;;  %v51_v32 = vld [vmem:[#allocation5 + $0x58] sm:$0xff]  ;;  %1885 = vmatprep.subr.bf16.mxu0 %v2303_v23  ;;  %v2312_v33 = vpack.c.bf16 %v46_v30, %v44_v29  ;;  %v48_v35 = vld [vmem:[#allocation5 + $0x40] sm:$0xff]  ;;  %v50_v36 = vld [vmem:[#allocation5 + $0x50] sm:$0xff]  ;;  %s2249_s11 = smov 119   ;;  %s2250_s12 = smov [#allocation7]  }
  0x2d   :  { %1871 = vmatpush1.bf16.msra.mxu1 %v2305_v27  ;;  %v2316_v34 = vpack.c.bf16 %v51_v32, %v49_v31  ;;  %v53_v37 = vld [vmem:[#allocation5 + $0x68] sm:$0xff]  ;;  %v55_v38 = vld [vmem:[#allocation5 + $0x78] sm:$0xff]  ;;  %v2320_v39 = vpack.c.bf16 %v50_v36, %v48_v35  ;;  %v52_v41 = vld [vmem:[#allocation5 + $0x60] sm:$0xff]  ;;  %s1737_s13 = sshll.u32 %s2250_s12, 4  ;;  %s1738_s13 = int_to_ptr.vmem [resolvable:$true] %s1737_s13 }
  0x2e   :  { %1814 = vmatmul.mubr.msk.f32.vlgmr.msra.gmra.mrb[0].mxu0 %vm85_vm0, %v84_v4  ;;  %1873 = vmatprep.subr.bf16.mxu1 %v2307_v28  ;;  %v2324_v40 = vpack.c.bf16 %v55_v38, %v53_v37  ;;  %v54_v42 = vld [vmem:[#allocation5 + $0x70] sm:$0xff]  ;;  %s2207_s14 = scalar_lea.vmem %s1738_s13, 16  ;;  %s2211_s15 = scalar_lea.vmem %s1738_s13, 32 }
  0x2f   :  { %1887 = vmatpush1.bf16.msra.mxu0 %v2305_v27  ;;  %v2329_v44 = vpack.c.bf16 %v54_v42, %v52_v41  ;;  %407 = vmatprep.mubr.f32.mxu0 %v2243_v45  ;;  %v2352_v50 = vld [vmem:[#allocation5 + $0xb0] ss:$0 sm:$0xff]  ;;  %p2208_p2 = scmp.ne.s32.totalorder %s1738_s13, %s2207_s14  ;;  %p2212_p3 = scmp.lt.s32.totalorder %s1738_s13, %s1738_s13 }
  0x30   :  { %1889 = vmatprep.subr.bf16.mxu0 %v2307_v28  ;;  %p2213_p4 = scmp.lt.s32.totalorder %s2211_s15, %s2207_s14 }
  0x31   :  { %1875 = vmatpush1.bf16.msra.mxu1 %v2312_v33 }
  0x32   :  { %1877 = vmatprep.subr.bf16.mxu1 %v2316_v34  ;;  %p2214_p5 = por %p2213_p4, %p2212_p3 }
  0x33   :  { %1891 = vmatpush1.bf16.msra.mxu0 %v2312_v33 }
  0x34   :  { %1893 = vmatprep.subr.bf16.mxu0 %v2316_v34  ;;  %p2215_p6 = pnand %p2214_p5, %p2208_p2 }
  0x35   :  { %1879 = vmatpush1.bf16.msra.mxu1 %v2320_v39 }
  0x36   :  { %1881 = vmatprep.subr.bf16.mxu1 %v2324_v40 }
  0x37   :  { %1895 = vmatpush1.bf16.msra.mxu0 %v2320_v39 }
  0x38   :  { %1897 = vmatprep.subr.bf16.mxu0 %v2324_v40 }
  0x39   :  { %1883 = vmatpush1.bf16.msra.mxu1 %v2329_v44 }
  0x3a   :  { %1901 = vmatprep.subr.bf16.mxu1 %v2303_v23 }
  0x3b   :  { %1899 = vmatpush1.bf16.msra.mxu0 %v2329_v44 }
  0x3c   :  { %1917 = vmatprep.subr.bf16.mxu0 %v2303_v23 }
 0x101   :  { %v1815_v6 = vpop.f32.mrb[0].mxu0 }
 0x102   :  { %v2292_v7 = vadd.f32 %v1815_v6, %v58_v5  ;;  %v158_v8 = vpop.f32.mrb[1].mxu0 }
 0x103   :  { %v2294_v9 = vadd.f32 %v158_v8, %v58_v5 }
 0x105   :  { %2035 = vtanh.f32 %v2294_v9  ;;  %v1749_v11 = vmul.f32 -1.442695, %v2294_v9 }
 0x107   :  { %2037 = vpow2.f32 %v1749_v11 }
 0x10f   :  { %v2036_v10 = vpop.eup %2035 }
 0x110   :  { %177 = vrot.lane.b32.xlu0 %v2036_v10, %s2241_s1 }
 0x111   :  { %v2038_v12 = vpop.eup %2037 }
 0x112   :  { %v171_v13 = vadd.f32 1.0, %v2038_v12 }
 0x114   :  { %2039 = vrcp.f32 %v171_v13 }
 0x11e   :  { %v2040_v14 = vpop.eup %2039 }
 0x11f   :  { %v175_v17 = vmul.f32 0.0, %v2040_v14 }
 0x182   :  { %v178_v15 = vpop.permute.xlu0 %177 }
 0x183   :  { %v180_v16 = vmul.f32 %v2040_v14, %v178_v15 }
 0x185   :  { %182 = vrot.lane.b32.xlu0 %v180_v16, %s2242_s8 }
 0x1f7   :  { %v183_v18 = vpop.permute.xlu0 %182 }
 0x1f8   :  { %v2300_v19 = vadd.f32 %v183_v18, %v175_v17 }
 0x1fa   :  { %2041 = vtanh.f32 %v2300_v19  ;;  %v310_v8 = vrot.slane %v2300_v19, 6 }
 0x204   :  { %v2042_v43 = vpop.eup %2041 }
 0x205   :  { %188 = vrot.lane.b32.xlu1 %v2042_v43, %s2241_s1 }
 0x277   :  { %v189_v46 = vpop.permute.xlu1 %188 }
 0x278   :  { %v191_v47 = vmul.f32 %v2040_v14, %v189_v46 }
 0x27a   :  { %193 = vrot.lane.b32.xlu1 %v191_v47, %s2242_s8 }
 0x2ec   :  { %v194_v48 = vpop.permute.xlu1 %193 }
 0x2ed   :  { %v197_v49 = vsel %vm196_vm1, %v194_v48, 0.0 }
 0x2ee   :  { %1750 = vmatmul.mubr.msk.f32.vlgmr.msra.gmra.mrb[0].mxu1 %vm198_vm2, %v197_v49 }
 0x2ef   :  { %1903 = vmatpush1.bf16.msra.mxu1 %v2305_v27  ;;  %548 = vmatprep.mubr.f32.mxu1 %v2243_v45 }
 0x2f0   :  { %1905 = vmatprep.subr.bf16.mxu1 %v2307_v28 }
 0x2f3   :  { %1907 = vmatpush1.bf16.msra.mxu1 %v2312_v33 }
 0x2f4   :  { %1909 = vmatprep.subr.bf16.mxu1 %v2316_v34 }
 0x2f7   :  { %1911 = vmatpush1.bf16.msra.mxu1 %v2320_v39 }
 0x2f8   :  { %1913 = vmatprep.subr.bf16.mxu1 %v2324_v40 }
 0x2fb   :  { %1915 = vmatpush1.bf16.msra.mxu1 %v2329_v44 }
 0x2fc   :  { %1933 = vmatprep.subr.bf16.mxu1 %v2303_v23 }
 0x3c1   :  { %v268_v51 = vpop.f32.mrb[0].mxu1 }
 0x3c2   :  { %v273_v52 = vadd.f32 %v268_v51, %v2352_v50  ;;  %v270_v53 = vpop.f32.mrb[1].mxu1 }
 0x3c3   :  { %v299_v54 = vrot.slane %v270_v53, 6 }
 0x3c4   :  { %2043 = vtanh.f32 %v273_v52  ;;  %v1751_v58 = vmul.f32 -1.442695, %v273_v52 }
 0x3c5   :  { %v301_v55 = vadd.f32 %v299_v54, %v2294_v9 }
 0x3c7   :  { %2045 = vtanh.f32 %v301_v55  ;;  %v1752_v59 = vmul.f32 -1.442695, %v301_v55 }
 0x3c8   :  { %2047 = vpow2.f32 %v1751_v58 }
 0x3c9   :  { %2049 = vpow2.f32 %v1752_v59 }
 0x3ce   :  { %v2044_v56 = vpop.eup %2043 }
 0x3cf   :  { %283 = vrot.lane.b32.xlu0 %v2044_v56, %s2241_s1 }
 0x3d1   :  { %v2046_v57 = vpop.eup %2045 }
 0x3d2   :  { %314 = vrot.lane.b32.xlu1 %v2046_v57, %s2241_s1  ;;  %v2048_v60 = vpop.eup %2047 }
 0x3d3   :  { %v2050_v61 = vpop.eup %2049  ;;  %v277_v62 = vadd.f32 1.0, %v2048_v60 }
 0x3d4   :  { %v305_v63 = vadd.f32 1.0, %v2050_v61 }
 0x3d5   :  { %2051 = vrcp.f32 %v277_v62 }
 0x3d6   :  { %2053 = vrcp.f32 %v305_v63 }
 0x3df   :  { %v2052_v0 = vpop.eup %2051 }
 0x3e0   :  { %v2054_v3 = vpop.eup %2053  ;;  %v281_v6 = vmul.f32 0.0, %v2052_v0 }
 0x3e1   :  { %v312_v12 = vmul.f32 %v2054_v3, %v310_v8 }
 0x441   :  { %v284_v1 = vpop.permute.xlu0 %283 }
 0x442   :  { %v286_v2 = vmul.f32 %v2052_v0, %v284_v1 }
 0x444   :  { %288 = vrot.lane.b32.xlu0 %v286_v2, %s2242_s8  ;;  %v315_v4 = vpop.permute.xlu1 %314 }
 0x445   :  { %v317_v5 = vmul.f32 %v2054_v3, %v315_v4 }
 0x447   :  { %319 = vrot.lane.b32.xlu1 %v317_v5, %s2242_s8 }
 0x4b6   :  { %v289_v10 = vpop.permute.xlu0 %288 }
 0x4b7   :  { %v291_v11 = vadd.f32 %v289_v10, %v281_v6 }
 0x4b9   :  { %2055 = vtanh.f32 %v291_v11  ;;  %v320_v13 = vpop.permute.xlu1 %319 }
 0x4ba   :  { %v322_v14 = vadd.f32 %v320_v13, %v312_v12 }
 0x4bc   :  { %2057 = vtanh.f32 %v322_v14  ;;  %v451_v56 = vrot.slane %v322_v14, 6 }
 0x4c3   :  { %v2056_v15 = vpop.eup %2055 }
 0x4c4   :  { %294 = vrot.lane.b32.xlu0 %v2056_v15, %s2241_s1 }
 0x4c6   :  { %v2058_v16 = vpop.eup %2057 }
 0x4c7   :  { %325 = vrot.lane.b32.xlu1 %v2058_v16, %s2241_s1 }
 0x536   :  { %v295_v17 = vpop.permute.xlu0 %294 }
 0x537   :  { %v297_v18 = vmul.f32 %v2052_v0, %v295_v17 }
 0x539   :  { %v334_v20 = vrot.slane %v297_v18, 6  ;;  %v326_v21 = vpop.permute.xlu1 %325 }
 0x53a   :  { %v328_v22 = vmul.f32 %v2054_v3, %v326_v21 }
 0x53b   :  { %335 = vrot.lane.b32.xlu1 %v334_v20, %s2241_s1 }
 0x53c   :  { %330 = vrot.lane.b32.xlu0 %v328_v22, %s2242_s8 }
 0x5ad   :  { %v336_v19 = vpop.permute.xlu1 %335 }
 0x5ae   :  { %v331_v24 = vpop.permute.xlu0 %330 }
 0x5af   :  { %v338_v25 = vsel %vm196_vm1, %v331_v24, %v336_v19 }
 0x5b0   :  { %v340_v26 = vrot.slane %v338_v25, 2 }
 0x5b2   :  { %1753 = vmatmul.mubr.msk.f32.vlgmr.msra.gmra.mrb[2].mxu0 %vm198_vm2, %v340_v26 }
 0x5b3   :  { %1919 = vmatpush1.bf16.msra.mxu0 %v2305_v27  ;;  %689 = vmatprep.mubr.f32.mxu0 %v2243_v45 }
 0x5b4   :  { %1921 = vmatprep.subr.bf16.mxu0 %v2307_v28 }
 0x5b7   :  { %1923 = vmatpush1.bf16.msra.mxu0 %v2312_v33 }
 0x5b8   :  { %1925 = vmatprep.subr.bf16.mxu0 %v2316_v34 }
 0x5bb   :  { %1927 = vmatpush1.bf16.msra.mxu0 %v2320_v39 }
 0x5bc   :  { %1929 = vmatprep.subr.bf16.mxu0 %v2324_v40 }
 0x5bf   :  { %1931 = vmatpush1.bf16.msra.mxu0 %v2329_v44 }
 0x5c0   :  { %1949 = vmatprep.subr.bf16.mxu0 %v2303_v23 }
 0x685   :  { %v409_v29 = vpop.f32.mrb[2].mxu0 }
 0x686   :  { %v414_v30 = vadd.f32 %v409_v29, %v2352_v50  ;;  %v411_v31 = vpop.f32.mrb[3].mxu0 }
 0x687   :  { %v440_v32 = vrot.slane %v411_v31, 4 }
 0x688   :  { %2059 = vtanh.f32 %v414_v30  ;;  %v1754_v38 = vmul.f32 -1.442695, %v414_v30 }
 0x689   :  { %v442_v35 = vadd.f32 %v440_v32, %v2294_v9 }
 0x68b   :  { %2061 = vtanh.f32 %v442_v35  ;;  %v1755_v41 = vmul.f32 -1.442695, %v442_v35 }
 0x68c   :  { %2063 = vpow2.f32 %v1754_v38 }
 0x68d   :  { %2065 = vpow2.f32 %v1755_v41 }
 0x692   :  { %v2060_v36 = vpop.eup %2059 }
 0x693   :  { %424 = vrot.lane.b32.xlu0 %v2060_v36, %s2241_s1 }
 0x695   :  { %v2062_v37 = vpop.eup %2061 }
 0x696   :  { %455 = vrot.lane.b32.xlu1 %v2062_v37, %s2241_s1  ;;  %v2064_v42 = vpop.eup %2063 }
 0x697   :  { %v2066_v43 = vpop.eup %2065  ;;  %v418_v46 = vadd.f32 1.0, %v2064_v42 }
 0x698   :  { %v446_v47 = vadd.f32 1.0, %v2066_v43 }
 0x699   :  { %2067 = vrcp.f32 %v418_v46 }
 0x69a   :  { %2069 = vrcp.f32 %v446_v47 }
 0x6a3   :  { %v2068_v48 = vpop.eup %2067 }
 0x6a4   :  { %v2070_v52 = vpop.eup %2069  ;;  %v422_v55 = vmul.f32 %v2068_v48, %v291_v11 }
 0x6a5   :  { %v453_v59 = vmul.f32 %v2070_v52, %v451_v56 }
 0x705   :  { %v425_v49 = vpop.permute.xlu0 %424 }
 0x706   :  { %v427_v51 = vmul.f32 %v2068_v48, %v425_v49 }
 0x708   :  { %429 = vrot.lane.b32.xlu0 %v427_v51, %s2242_s8  ;;  %v456_v53 = vpop.permute.xlu1 %455 }
 0x709   :  { %v458_v54 = vmul.f32 %v2070_v52, %v456_v53 }
 0x70b   :  { %460 = vrot.lane.b32.xlu1 %v458_v54, %s2242_s8 }
 0x77a   :  { %v430_v57 = vpop.permute.xlu0 %429 }
 0x77b   :  { %v432_v58 = vadd.f32 %v430_v57, %v422_v55 }
 0x77d   :  { %2071 = vtanh.f32 %v432_v58  ;;  %v461_v60 = vpop.permute.xlu1 %460 }
 0x77e   :  { %v463_v61 = vadd.f32 %v461_v60, %v453_v59 }
 0x780   :  { %2073 = vtanh.f32 %v463_v61  ;;  %v592_v35 = vrot.slane %v463_v61, 6 }
 0x787   :  { %v2072_v62 = vpop.eup %2071 }
 0x788   :  { %435 = vrot.lane.b32.xlu0 %v2072_v62, %s2241_s1 }
 0x78a   :  { %v2074_v63 = vpop.eup %2073 }
 0x78b   :  { %466 = vrot.lane.b32.xlu1 %v2074_v63, %s2241_s1 }
 0x7fa   :  { %v436_v0 = vpop.permute.xlu0 %435 }
 0x7fb   :  { %v438_v1 = vmul.f32 %v2068_v48, %v436_v0 }
 0x7fd   :  { %v475_v2 = vrot.slane %v438_v1, 4  ;;  %v467_v3 = vpop.permute.xlu1 %466 }
 0x7fe   :  { %v469_v4 = vmul.f32 %v2070_v52, %v467_v3 }
 0x7ff   :  { %476 = vrot.lane.b32.xlu1 %v475_v2, %s2241_s1 }
 0x800   :  { %471 = vrot.lane.b32.xlu0 %v469_v4, %s2242_s8 }
 0x871   :  { %v477_v5 = vpop.permute.xlu1 %476 }
 0x872   :  { %v472_v6 = vpop.permute.xlu0 %471 }
 0x873   :  { %v479_v8 = vsel %vm196_vm1, %v472_v6, %v477_v5 }
 0x874   :  { %v481_v10 = vrot.slane %v479_v8, 4 }
 0x876   :  { %1756 = vmatmul.mubr.msk.f32.vlgmr.msra.gmra.mrb[2].mxu1 %vm198_vm2, %v481_v10 }
 0x877   :  { %1935 = vmatpush1.bf16.msra.mxu1 %v2305_v27  ;;  %825 = vmatprep.mubr.f32.mxu1 %v2243_v45 }
 0x878   :  { %1937 = vmatprep.subr.bf16.mxu1 %v2307_v28 }
 0x87b   :  { %1939 = vmatpush1.bf16.msra.mxu1 %v2312_v33 }
 0x87c   :  { %1941 = vmatprep.subr.bf16.mxu1 %v2316_v34 }
 0x87f   :  { %1943 = vmatpush1.bf16.msra.mxu1 %v2320_v39 }
 0x880   :  { %1945 = vmatprep.subr.bf16.mxu1 %v2324_v40 }
 0x883   :  { %1947 = vmatpush1.bf16.msra.mxu1 %v2329_v44 }
 0x884   :  { %1965 = vmatprep.subr.bf16.mxu1 %v2303_v23 }
 0x949   :  { %v550_v11 = vpop.f32.mrb[2].mxu1 }
 0x94a   :  { %v555_v12 = vadd.f32 %v550_v11, %v2352_v50  ;;  %v552_v13 = vpop.f32.mrb[3].mxu1 }
 0x94b   :  { %v581_v14 = vrot.slane %v552_v13, 2 }
 0x94c   :  { %2075 = vtanh.f32 %v555_v12  ;;  %v1757_v18 = vmul.f32 -1.442695, %v555_v12 }
 0x94d   :  { %v583_v15 = vadd.f32 %v581_v14, %v2294_v9 }
 0x94f   :  { %2077 = vtanh.f32 %v583_v15  ;;  %v1758_v20 = vmul.f32 -1.442695, %v583_v15 }
 0x950   :  { %2079 = vpow2.f32 %v1757_v18 }
 0x951   :  { %2081 = vpow2.f32 %v1758_v20 }
 0x956   :  { %v2076_v16 = vpop.eup %2075 }
 0x957   :  { %565 = vrot.lane.b32.xlu0 %v2076_v16, %s2241_s1 }
 0x959   :  { %v2078_v17 = vpop.eup %2077 }
 0x95a   :  { %596 = vrot.lane.b32.xlu1 %v2078_v17, %s2241_s1  ;;  %v2080_v21 = vpop.eup %2079 }
 0x95b   :  { %v2082_v22 = vpop.eup %2081  ;;  %v559_v19 = vadd.f32 1.0, %v2080_v21 }
 0x95c   :  { %v587_v24 = vadd.f32 1.0, %v2082_v22 }
 0x95d   :  { %2083 = vrcp.f32 %v559_v19 }
 0x95e   :  { %2085 = vrcp.f32 %v587_v24 }
 0x967   :  { %v2084_v25 = vpop.eup %2083 }
 0x968   :  { %v2086_v29 = vpop.eup %2085  ;;  %v563_v32 = vmul.f32 %v2084_v25, %v432_v58 }
 0x969   :  { %v594_v38 = vmul.f32 %v2086_v29, %v592_v35 }
 0x9c9   :  { %v566_v26 = vpop.permute.xlu0 %565 }
 0x9ca   :  { %v568_v9 = vmul.f32 %v2084_v25, %v566_v26 }
 0x9cc   :  { %570 = vrot.lane.b32.xlu0 %v568_v9, %s2242_s8  ;;  %v597_v30 = vpop.permute.xlu1 %596 }
 0x9cd   :  { %v599_v31 = vmul.f32 %v2086_v29, %v597_v30 }
 0x9cf   :  { %601 = vrot.lane.b32.xlu1 %v599_v31, %s2242_s8 }
 0xa3e   :  { %v571_v36 = vpop.permute.xlu0 %570 }
 0xa3f   :  { %v573_v37 = vadd.f32 %v571_v36, %v563_v32 }
 0xa41   :  { %2087 = vtanh.f32 %v573_v37  ;;  %v602_v41 = vpop.permute.xlu1 %601 }
 0xa42   :  { %v604_v42 = vadd.f32 %v602_v41, %v594_v38 }
 0xa44   :  { %2089 = vtanh.f32 %v604_v42  ;;  %v730_v12 = vrot.slane %v604_v42, 6 }
 0xa4b   :  { %v2088_v43 = vpop.eup %2087 }
 0xa4c   :  { %576 = vrot.lane.b32.xlu0 %v2088_v43, %s2241_s1 }
 0xa4e   :  { %v2090_v46 = vpop.eup %2089 }
 0xa4f   :  { %607 = vrot.lane.b32.xlu1 %v2090_v46, %s2241_s1 }
 0xabe   :  { %v577_v47 = vpop.permute.xlu0 %576 }
 0xabf   :  { %v579_v48 = vmul.f32 %v2084_v25, %v577_v47 }
 0xac1   :  { %v616_v49 = vrot.slane %v579_v48, 2  ;;  %v608_v51 = vpop.permute.xlu1 %607 }
 0xac2   :  { %v610_v52 = vmul.f32 %v2086_v29, %v608_v51 }
 0xac3   :  { %617 = vrot.lane.b32.xlu1 %v616_v49, %s2241_s1 }
 0xac4   :  { %612 = vrot.lane.b32.xlu0 %v610_v52, %s2242_s8 }
 0xb35   :  { %v618_v53 = vpop.permute.xlu1 %617 }
 0xb36   :  { %v613_v54 = vpop.permute.xlu0 %612 }
 0xb37   :  { %v620_v55 = vsel %vm196_vm1, %v613_v54, %v618_v53 }
 0xb38   :  { %v622_v56 = vrot.slane %v620_v55, 6 }
 0xb3a   :  { %1759 = vmatmul.mubr.msk.f32.vlgmr.msra.gmra.mrb[4].mxu0 %vm198_vm2, %v622_v56 }
 0xb3b   :  { %1951 = vmatpush1.bf16.msra.mxu0 %v2305_v27  ;;  %966 = vmatprep.mubr.f32.mxu0 %v2243_v45 }
 0xb3c   :  { %1953 = vmatprep.subr.bf16.mxu0 %v2307_v28 }
 0xb3f   :  { %1955 = vmatpush1.bf16.msra.mxu0 %v2312_v33 }
 0xb40   :  { %1957 = vmatprep.subr.bf16.mxu0 %v2316_v34 }
 0xb43   :  { %1959 = vmatpush1.bf16.msra.mxu0 %v2320_v39 }
 0xb44   :  { %1961 = vmatprep.subr.bf16.mxu0 %v2324_v40 }
 0xb47   :  { %1963 = vmatpush1.bf16.msra.mxu0 %v2329_v44 }
 0xb48   :  { %1981 = vmatprep.subr.bf16.mxu0 %v2303_v23 }
 0xc0d   :  { %v691_v57 = vpop.f32.mrb[4].mxu0 }
 0xc0e   :  { %v696_v58 = vadd.f32 %v691_v57, %v2352_v50  ;;  %v693_v59 = vpop.f32.mrb[5].mxu0 }
 0xc0f   :  { %v721_v60 = vadd.f32 %v693_v59, %v2292_v7 }
 0xc10   :  { %2091 = vtanh.f32 %v696_v58  ;;  %v1760_v63 = vmul.f32 -1.442695, %v696_v58 }
 0xc11   :  { %2093 = vtanh.f32 %v721_v60  ;;  %v1761_v0 = vmul.f32 -1.442695, %v721_v60 }
 0xc12   :  { %2095 = vpow2.f32 %v1760_v63 }
 0xc13   :  { %2097 = vpow2.f32 %v1761_v0 }
 0xc1a   :  { %v2092_v61 = vpop.eup %2091 }
 0xc1b   :  { %v2094_v62 = vpop.eup %2093  ;;  %706 = vrot.lane.b32.xlu0 %v2092_v61, %s2241_s1 }
 0xc1c   :  { %734 = vrot.lane.b32.xlu1 %v2094_v62, %s2241_s1  ;;  %v2096_v1 = vpop.eup %2095 }
 0xc1d   :  { %v2098_v23 = vpop.eup %2097  ;;  %v700_v2 = vadd.f32 1.0, %v2096_v1 }
 0xc1e   :  { %v725_v3 = vadd.f32 1.0, %v2098_v23 }
 0xc1f   :  { %2099 = vrcp.f32 %v700_v2 }
 0xc20   :  { %2101 = vrcp.f32 %v725_v3 }
 0xc29   :  { %v2100_v4 = vpop.eup %2099 }
 0xc2a   :  { %v2102_v6 = vpop.eup %2101  ;;  %v704_v13 = vmul.f32 %v2100_v4, %v573_v37 }
 0xc2b   :  { %v732_v15 = vmul.f32 %v2102_v6, %v730_v12 }
 0xc8d   :  { %v707_v5 = vpop.permute.xlu0 %706 }
 0xc8e   :  { %v709_v8 = vmul.f32 %v2100_v4, %v707_v5  ;;  %v735_v10 = vpop.permute.xlu1 %734 }
 0xc8f   :  { %v737_v11 = vmul.f32 %v2102_v6, %v735_v10 }
 0xc90   :  { %711 = vrot.lane.b32.xlu0 %v709_v8, %s2242_s8 }
 0xc91   :  { %739 = vrot.lane.b32.xlu1 %v737_v11, %s2242_s8 }
 0xd02   :  { %v712_v14 = vpop.permute.xlu0 %711 }
 0xd03   :  { %v714_v16 = vadd.f32 %v712_v14, %v704_v13  ;;  %v740_v17 = vpop.permute.xlu1 %739 }
 0xd04   :  { %v742_v18 = vadd.f32 %v740_v17, %v732_v15 }
 0xd05   :  { %2103 = vtanh.f32 %v714_v16 }
 0xd06   :  { %2105 = vtanh.f32 %v742_v18  ;;  %v869_v57 = vrot.slane %v742_v18, 6 }
 0xd0f   :  { %v2104_v20 = vpop.eup %2103 }
 0xd10   :  { %v2106_v21 = vpop.eup %2105  ;;  %717 = vrot.lane.b32.xlu0 %v2104_v20, %s2241_s1 }
 0xd11   :  { %745 = vrot.lane.b32.xlu1 %v2106_v21, %s2241_s1 }
 0xd82   :  { %v718_v22 = vpop.permute.xlu0 %717 }
 0xd83   :  { %v720_v19 = vmul.f32 %v2100_v4, %v718_v22  ;;  %v746_v24 = vpop.permute.xlu1 %745 }
 0xd84   :  { %v748_v25 = vmul.f32 %v2102_v6, %v746_v24 }
 0xd85   :  { %754 = vrot.lane.b32.xlu1 %v720_v19, %s2241_s1 }
 0xd86   :  { %750 = vrot.lane.b32.xlu0 %v748_v25, %s2242_s8 }
 0xdf7   :  { %v755_v26 = vpop.permute.xlu1 %754 }
 0xdf8   :  { %v751_v9 = vpop.permute.xlu0 %750 }
 0xdf9   :  { %v757_v29 = vsel %vm196_vm1, %v751_v9, %v755_v26 }
 0xdfa   :  { %1762 = vmatmul.mubr.msk.f32.vlgmr.msra.gmra.mrb[4].mxu1 %vm198_vm2, %v757_v29 }
 0xdfb   :  { %1967 = vmatpush1.bf16.msra.mxu1 %v2305_v27  ;;  %1107 = vmatprep.mubr.f32.mxu1 %v2243_v45 }
 0xdfc   :  { %1969 = vmatprep.subr.bf16.mxu1 %v2307_v28 }
 0xdff   :  { %1971 = vmatpush1.bf16.msra.mxu1 %v2312_v33 }
 0xe00   :  { %1973 = vmatprep.subr.bf16.mxu1 %v2316_v34 }
 0xe03   :  { %1975 = vmatpush1.bf16.msra.mxu1 %v2320_v39 }
 0xe04   :  { %1977 = vmatprep.subr.bf16.mxu1 %v2324_v40 }
 0xe07   :  { %1979 = vmatpush1.bf16.msra.mxu1 %v2329_v44 }
 0xecd   :  { %v827_v30 = vpop.f32.mrb[4].mxu1 }
 0xece   :  { %v832_v31 = vadd.f32 %v827_v30, %v2352_v50  ;;  %v829_v32 = vpop.f32.mrb[5].mxu1 }
 0xecf   :  { %v858_v35 = vrot.slane %v829_v32, 6 }
 0xed0   :  { %2107 = vtanh.f32 %v832_v31  ;;  %v1763_v41 = vmul.f32 -1.442695, %v832_v31 }
 0xed1   :  { %v860_v36 = vadd.f32 %v858_v35, %v2292_v7 }
 0xed3   :  { %2109 = vtanh.f32 %v860_v36  ;;  %v1764_v42 = vmul.f32 -1.442695, %v860_v36 }
 0xed4   :  { %2111 = vpow2.f32 %v1763_v41 }
 0xed5   :  { %2113 = vpow2.f32 %v1764_v42 }
 0xeda   :  { %v2108_v37 = vpop.eup %2107 }
 0xedb   :  { %842 = vrot.lane.b32.xlu0 %v2108_v37, %s2241_s1 }
 0xedd   :  { %v2110_v38 = vpop.eup %2109 }
 0xede   :  { %873 = vrot.lane.b32.xlu1 %v2110_v38, %s2241_s1  ;;  %v2112_v43 = vpop.eup %2111 }
 0xedf   :  { %v2114_v46 = vpop.eup %2113  ;;  %v836_v47 = vadd.f32 1.0, %v2112_v43 }
 0xee0   :  { %v864_v48 = vadd.f32 1.0, %v2114_v46 }
 0xee1   :  { %2115 = vrcp.f32 %v836_v47 }
 0xee2   :  { %2117 = vrcp.f32 %v864_v48 }
 0xeeb   :  { %v2116_v49 = vpop.eup %2115 }
 0xeec   :  { %v2118_v53 = vpop.eup %2117  ;;  %v840_v56 = vmul.f32 %v2116_v49, %v714_v16 }
 0xeed   :  { %v871_v60 = vmul.f32 %v2118_v53, %v869_v57 }
 0xf4d   :  { %v843_v51 = vpop.permute.xlu0 %842 }
 0xf4e   :  { %v845_v52 = vmul.f32 %v2116_v49, %v843_v51 }
 0xf50   :  { %847 = vrot.lane.b32.xlu0 %v845_v52, %s2242_s8  ;;  %v874_v54 = vpop.permute.xlu1 %873 }
 0xf51   :  { %v876_v55 = vmul.f32 %v2118_v53, %v874_v54 }
 0xf53   :  { %878 = vrot.lane.b32.xlu1 %v876_v55, %s2242_s8 }
 0xfc2   :  { %v848_v58 = vpop.permute.xlu0 %847 }
 0xfc3   :  { %v850_v59 = vadd.f32 %v848_v58, %v840_v56 }
 0xfc5   :  { %2119 = vtanh.f32 %v850_v59  ;;  %v879_v61 = vpop.permute.xlu1 %878 }
 0xfc6   :  { %v881_v62 = vadd.f32 %v879_v61, %v871_v60 }
 0xfc8   :  { %2121 = vtanh.f32 %v881_v62  ;;  %v1010_v25 = vrot.slane %v881_v62, 6 }
 0xfcf   :  { %v2120_v63 = vpop.eup %2119 }
 0xfd0   :  { %853 = vrot.lane.b32.xlu0 %v2120_v63, %s2241_s1 }
 0xfd2   :  { %v2122_v0 = vpop.eup %2121 }
 0xfd3   :  { %884 = vrot.lane.b32.xlu1 %v2122_v0, %s2241_s1 }
0x1042   :  { %v854_v1 = vpop.permute.xlu0 %853 }
0x1043   :  { %v856_v23 = vmul.f32 %v2116_v49, %v854_v1 }
0x1045   :  { %v893_v2 = vrot.slane %v856_v23, 6  ;;  %v885_v3 = vpop.permute.xlu1 %884 }
0x1046   :  { %v887_v4 = vmul.f32 %v2118_v53, %v885_v3 }
0x1047   :  { %894 = vrot.lane.b32.xlu1 %v893_v2, %s2241_s1 }
0x1048   :  { %889 = vrot.lane.b32.xlu0 %v887_v4, %s2242_s8 }
0x10b9   :  { %v895_v5 = vpop.permute.xlu1 %894 }
0x10ba   :  { %v890_v6 = vpop.permute.xlu0 %889 }
0x10bb   :  { %v897_v8 = vsel %vm196_vm1, %v890_v6, %v895_v5 }
0x10bc   :  { %v899_v10 = vrot.slane %v897_v8, 2 }
0x10be   :  { %1765 = vmatmul.mubr.msk.f32.vlgmr.msra.gmra.mrb[6].mxu0 %vm198_vm2, %v899_v10 }
0x10bf   :  { %1983 = vmatpush1.bf16.msra.mxu0 %v2305_v27  ;;  %1248 = vmatprep.mubr.f32.mxu0 %v2243_v45 }
0x10c0   :  { %1985 = vmatprep.subr.bf16.mxu0 %v2307_v28 }
0x10c3   :  { %1987 = vmatpush1.bf16.msra.mxu0 %v2312_v33 }
0x10c4   :  { %1989 = vmatprep.subr.bf16.mxu0 %v2316_v34 }
0x10c7   :  { %1991 = vmatpush1.bf16.msra.mxu0 %v2320_v39 }
0x10c8   :  { %1993 = vmatprep.subr.bf16.mxu0 %v2324_v40 }
0x10cb   :  { %1995 = vmatpush1.bf16.msra.mxu0 %v2329_v44 }
0x1191   :  { %v968_v11 = vpop.f32.mrb[6].mxu0 }
0x1192   :  { %v973_v12 = vadd.f32 %v968_v11, %v2352_v50  ;;  %v970_v13 = vpop.f32.mrb[7].mxu0 }
0x1193   :  { %v999_v14 = vrot.slane %v970_v13, 4 }
0x1194   :  { %2123 = vtanh.f32 %v973_v12  ;;  %v1766_v34 = vmul.f32 -1.442695, %v973_v12 }
0x1195   :  { %v1001_v27 = vadd.f32 %v999_v14, %v2292_v7 }
0x1197   :  { %2125 = vtanh.f32 %v1001_v27  ;;  %v1767_v39 = vmul.f32 -1.442695, %v1001_v27 }
0x1198   :  { %2127 = vpow2.f32 %v1766_v34 }
0x1199   :  { %2129 = vpow2.f32 %v1767_v39 }
0x119e   :  { %v2124_v28 = vpop.eup %2123 }
0x119f   :  { %983 = vrot.lane.b32.xlu0 %v2124_v28, %s2241_s1 }
0x11a1   :  { %v2126_v33 = vpop.eup %2125 }
0x11a2   :  { %1014 = vrot.lane.b32.xlu1 %v2126_v33, %s2241_s1  ;;  %v2128_v40 = vpop.eup %2127 }
0x11a3   :  { %v2130_v44 = vpop.eup %2129  ;;  %v977_v15 = vadd.f32 1.0, %v2128_v40 }
0x11a4   :  { %v1005_v16 = vadd.f32 1.0, %v2130_v44 }
0x11a5   :  { %2131 = vrcp.f32 %v977_v15 }
0x11a6   :  { %2133 = vrcp.f32 %v1005_v16 }
0x11af   :  { %v2132_v17 = vpop.eup %2131 }
0x11b0   :  { %v2134_v21 = vpop.eup %2133  ;;  %v981_v24 = vmul.f32 %v2132_v17, %v850_v59 }
0x11b1   :  { %v1012_v29 = vmul.f32 %v2134_v21, %v1010_v25 }
0x1211   :  { %v984_v18 = vpop.permute.xlu0 %983 }
0x1212   :  { %v986_v20 = vmul.f32 %v2132_v17, %v984_v18 }
0x1214   :  { %988 = vrot.lane.b32.xlu0 %v986_v20, %s2242_s8  ;;  %v1015_v22 = vpop.permute.xlu1 %1014 }
0x1215   :  { %v1017_v19 = vmul.f32 %v2134_v21, %v1015_v22 }
0x1217   :  { %1019 = vrot.lane.b32.xlu1 %v1017_v19, %s2242_s8 }
0x1286   :  { %v989_v26 = vpop.permute.xlu0 %988 }
0x1287   :  { %v991_v9 = vadd.f32 %v989_v26, %v981_v24 }
0x1289   :  { %2135 = vtanh.f32 %v991_v9  ;;  %v1020_v30 = vpop.permute.xlu1 %1019 }
0x128a   :  { %v1022_v31 = vadd.f32 %v1020_v30, %v1012_v29 }
0x128c   :  { %2137 = vtanh.f32 %v1022_v31  ;;  %v1151_v4 = vrot.slane %v1022_v31, 6  ;;  %v61_v31 = vld [vmem:[#allocation5 + $0xd0] sm:$0xff] }
0x1293   :  { %v2136_v32 = vpop.eup %2135 }
0x1294   :  { %994 = vrot.lane.b32.xlu0 %v2136_v32, %s2241_s1  ;;  %v62_v32 = vld [vmem:[#allocation5 + $0xe0] sm:$0xff] }
0x1296   :  { %v2138_v35 = vpop.eup %2137 }
0x1297   :  { %1025 = vrot.lane.b32.xlu1 %v2138_v35, %s2241_s1  ;;  %v2244_v35 = vmov 0.0|0.0  }
0x1298   :  { %1996 = vmatprep.subr.bf16.mxu1 %v2244_v35  ;;  %2002 = vmatprep.subr.bf16.mxu0 %v2244_v35 }
0x1306   :  { %v995_v36 = vpop.permute.xlu0 %994 }
0x1307   :  { %v997_v37 = vmul.f32 %v2132_v17, %v995_v36 }
0x1309   :  { %v1034_v38 = vrot.slane %v997_v37, 4  ;;  %v1026_v41 = vpop.permute.xlu1 %1025  ;;  %v63_v37 = vld [vmem:[#allocation5 + $0xf0] sm:$0xff] }
0x130a   :  { %v1028_v42 = vmul.f32 %v2134_v21, %v1026_v41 }
0x130b   :  { %1035 = vrot.lane.b32.xlu1 %v1034_v38, %s2241_s1  ;;  %v2000_v38 = vpack.c.bf16 %v63_v37, %v62_v32 }
0x130c   :  { %1030 = vrot.lane.b32.xlu0 %v1028_v42, %s2242_s8  ;;  %v65_v42 = vld [vmem:[#allocation5 + $0x110] sm:$0xff] }
0x137d   :  { %v1036_v43 = vpop.permute.xlu1 %1035 }
0x137e   :  { %v1031_v46 = vpop.permute.xlu0 %1030 }
0x137f   :  { %v1038_v47 = vsel %vm196_vm1, %v1031_v46, %v1036_v43  ;;  %v66_v43 = vld [vmem:[#allocation5 + $0x120] sm:$0xff] }
0x1380   :  { %v1040_v48 = vrot.slane %v1038_v47, 4  ;;  %v2003_v46 = vpack.c.bf16 %v66_v43, %v65_v42 }
0x1382   :  { %1768 = vmatmul.mubr.msk.f32.vlgmr.msra.gmra.mrb[6].mxu1 %vm198_vm2, %v1040_v48 }
0x1383   :  { %1824 = vmatprep.mubr.msk.f32.mxu1 %vm2245_vm3, %v2243_v45 }
0x1455   :  { %v1109_v49 = vpop.f32.mrb[6].mxu1 }
0x1456   :  { %v1114_v51 = vadd.f32 %v1109_v49, %v2352_v50  ;;  %v1111_v52 = vpop.f32.mrb[7].mxu1 }
0x1457   :  { %v1140_v53 = vrot.slane %v1111_v52, 2 }
0x1458   :  { %2139 = vtanh.f32 %v1114_v51  ;;  %v1769_v57 = vmul.f32 -1.442695, %v1114_v51 }
0x1459   :  { %v1142_v54 = vadd.f32 %v1140_v53, %v2292_v7 }
0x145b   :  { %2141 = vtanh.f32 %v1142_v54  ;;  %v1770_v58 = vmul.f32 -1.442695, %v1142_v54  ;;  %v67_v54 = vld [vmem:[#allocation5 + $0x130] sm:$0xff] }
0x145c   :  { %2143 = vpow2.f32 %v1769_v57  ;;  %v64_v57 = vld [vmem:[#allocation5 + $0x100] ss:$0 sm:$0xff] }
0x145d   :  { %2145 = vpow2.f32 %v1770_v58 }
0x1462   :  { %v2140_v55 = vpop.eup %2139 }
0x1463   :  { %1124 = vrot.lane.b32.xlu0 %v2140_v55, %s2241_s1  ;;  %v68_v55 = vld [vmem:[#allocation5 + $0x140] sm:$0xff] }
0x1465   :  { %v2142_v56 = vpop.eup %2141 }
0x1466   :  { %1155 = vrot.lane.b32.xlu1 %v2142_v56, %s2241_s1  ;;  %v2144_v59 = vpop.eup %2143  ;;  %v2006_v56 = vpack.c.bf16 %v68_v55, %v67_v54 }
0x1467   :  { %v2146_v60 = vpop.eup %2145  ;;  %v1118_v61 = vadd.f32 1.0, %v2144_v59 }
0x1468   :  { %v1146_v62 = vadd.f32 1.0, %v2146_v60 }
0x1469   :  { %2147 = vrcp.f32 %v1118_v61 }
0x146a   :  { %2149 = vrcp.f32 %v1146_v62  ;;  %v70_v62 = vld [vmem:[#allocation5 + $0x160] sm:$0xff] }
0x1473   :  { %v2148_v63 = vpop.eup %2147 }
0x1474   :  { %v2150_v1 = vpop.eup %2149  ;;  %v1122_v3 = vmul.f32 %v2148_v63, %v991_v9 }
0x1475   :  { %v1153_v8 = vmul.f32 %v2150_v1, %v1151_v4 }
0x14d5   :  { %v1125_v0 = vpop.permute.xlu0 %1124 }
0x14d6   :  { %v1127_v7 = vmul.f32 %v2148_v63, %v1125_v0  ;;  %v74_v0 = vld [vmem:[#allocation5 + $0x1a0] sm:$0xff] }
0x14d8   :  { %1129 = vrot.lane.b32.xlu0 %v1127_v7, %s2242_s8  ;;  %v1156_v23 = vpop.permute.xlu1 %1155  ;;  %v2246_v7 = vmov 0  }
0x14d9   :  { %v1158_v2 = vmul.f32 %v2150_v1, %v1156_v23  ;;  %2034 = vset.pattern.permute.xlu1 %v2246_v7  ;;  %2033 = vset.pattern.permute.xlu0 %v2246_v7  ;;  %v77_v23 = vld [vmem:[#allocation5 + $0x1d0] sm:$0xff] }
0x14db   :  { %1160 = vrot.lane.b32.xlu1 %v1158_v2, %s2242_s8  ;;  %v79_v2 = vld [vmem:[#allocation5 + $0x1f0] sm:$0xf] }
0x154a   :  { %v1130_v5 = vpop.permute.xlu0 %1129 }
0x154b   :  { %v1132_v6 = vadd.f32 %v1130_v5, %v1122_v3  ;;  %v69_v3 = vld [vmem:[#allocation5 + $0x150] ss:$0 sm:$0xff] }
0x154d   :  { %2151 = vtanh.f32 %v1132_v6  ;;  %v1161_v10 = vpop.permute.xlu1 %1160 }
0x154e   :  { %v1163_v11 = vadd.f32 %v1161_v10, %v1153_v8  ;;  %v71_v8 = vld [vmem:[#allocation5 + $0x170] sm:$0xff]  ;;  %v72_v10 = vld [vmem:[#allocation5 + $0x180] sm:$0xff] }
0x1550   :  { %2153 = vtanh.f32 %v1163_v11  ;;  %v73_v11 = vld [vmem:[#allocation5 + $0x190] sm:$0xff] }
0x1557   :  { %v2152_v12 = vpop.eup %2151 }
0x1558   :  { %1135 = vrot.lane.b32.xlu0 %v2152_v12, %s2241_s1  ;;  %v80_v12 = vld [vmem:[#allocation5 + $0x200] sm:$0xff] }
0x155a   :  { %v2154_v13 = vpop.eup %2153 }
0x155b   :  { %1166 = vrot.lane.b32.xlu1 %v2154_v13, %s2241_s1  ;;  %v81_v13 = vld [vmem:[#allocation5 + $0x210] sm:$0xff] }
0x15ca   :  { %v1136_v14 = vpop.permute.xlu0 %1135 }
0x15cb   :  { %v1138_v27 = vmul.f32 %v2148_v63, %v1136_v14  ;;  %v75_v63 = vld [vmem:[#allocation5 + $0x1b0] sm:$0xff]  ;;  %v2015_v14 = vpack.c.bf16 %v81_v13, %v80_v12 }
0x15cd   :  { %v1175_v28 = vrot.slane %v1138_v27, 2  ;;  %v1167_v33 = vpop.permute.xlu1 %1166 }
0x15ce   :  { %v1169_v34 = vmul.f32 %v2150_v1, %v1167_v33  ;;  %v76_v1 = vld [vmem:[#allocation5 + $0x1c0] sm:$0xff] }
0x15cf   :  { %1176 = vrot.lane.b32.xlu1 %v1175_v28, %s2241_s1 }
0x15d0   :  { %1171 = vrot.lane.b32.xlu0 %v1169_v34, %s2242_s8  ;;  %v1279_v49 = vrot.slane %v1169_v34, 6 }
0x1641   :  { %v1177_v39 = vpop.permute.xlu1 %1176 }
0x1642   :  { %v1172_v40 = vpop.permute.xlu0 %1171 }
0x1643   :  { %v1179_v44 = vsel %vm196_vm1, %v1172_v40, %v1177_v39 }
0x1644   :  { %v1181_v15 = vrot.slane %v1179_v44, 6 }
0x1646   :  { %1771 = vmatmul.mubr.msk.f32.vlgmr.msra.gmra.mrb[8].mxu0 %vm198_vm2, %v1181_v15 }
0x1647   :  { %1835 = vmatprep.mubr.msk.f32.mxu0 %vm2245_vm3, %v2243_v45  ;;  %2004 = vmatpush3.bf16.msra.mxu0 %v2003_v46 }
0x1648   :  { %2005 = vmatprep.subr.bf16.mxu0 %v2244_v35 }
0x164b   :  { %2007 = vmatpush3.bf16.msra.mxu0 %v2006_v56 }
0x164c   :  { %2008 = vmatprep.subr.bf16.mxu0 %v2244_v35 }
0x1719   :  { %v1250_v16 = vpop.f32.mrb[8].mxu0 }
0x171a   :  { %v1254_v17 = vadd.f32 %v1250_v16, %v2352_v50  ;;  %v1252_v18 = vpop.f32.mrb[9].mxu0  ;;  %v60_v50 = vld [vmem:[#allocation5 + $0xc0] sm:$0xff] }
0x171b   :  { %v1997_v36 = vpack.c.bf16 %v61_v31, %v60_v50 }
0x171c   :  { %2155 = vtanh.f32 %v1254_v17  ;;  %v1772_v21 = vmul.f32 -1.442695, %v1254_v17 }
0x171d   :  { %1998 = vmatpush3.bf16.msra.mxu1 %v1997_v36 }
0x171e   :  { %2157 = vpow2.f32 %v1772_v21  ;;  %1999 = vmatprep.subr.bf16.mxu1 %v2244_v35 }
0x1721   :  { %2001 = vmatpush3.bf16.msra.mxu1 %v2000_v38  ;;  %v82_v38 = vld [vmem:[#allocation5 + $0x220] ss:$0 sm:$0xff] }
0x1726   :  { %v2156_v20 = vpop.eup %2155 }
0x1727   :  { %1264 = vrot.lane.b32.xlu0 %v2156_v20, %s2241_s1 }
0x1728   :  { %v2158_v22 = vpop.eup %2157 }
0x1729   :  { %v1258_v19 = vadd.f32 1.0, %v2158_v22 }
0x172b   :  { %2159 = vrcp.f32 %v1258_v19 }
0x1735   :  { %v2160_v24 = vpop.eup %2159 }
0x1736   :  { %v1262_v9 = vmul.f32 %v2160_v24, %v1132_v6 }
0x1799   :  { %v1265_v25 = vpop.permute.xlu0 %1264 }
0x179a   :  { %v1267_v26 = vmul.f32 %v2160_v24, %v1265_v25 }
0x179c   :  { %1269 = vrot.lane.b32.xlu1 %v1267_v26, %s2242_s8  ;;  %v78_v26 = vld [vmem:[#allocation5 + $0x1e0] sm:$0xf] }
0x180e   :  { %v1270_v29 = vpop.permute.xlu1 %1269 }
0x180f   :  { %v1272_v30 = vadd.f32 %v1270_v29, %v1262_v9 }
0x1811   :  { %2161 = vtanh.f32 %v1272_v30 }
0x181b   :  { %v2162_v41 = vpop.eup %2161 }
0x181c   :  { %1275 = vrot.lane.b32.xlu0 %v2162_v41, %s2241_s1 }
0x1820   :  { %1437 = vperm.xlu0 %2033, %v74_v0  }
0x1824   :  { %1452 = vperm.xlu0 %2033, %v77_v23  }
0x188e   :  { %v1276_v47 = vpop.permute.xlu0 %1275 }
0x188f   :  { %v1278_v48 = vmul.f32 %v2160_v24, %v1276_v47 }
0x1891   :  { %v1282_v51 = vrot.slane %v1278_v48, 6 }
0x1893   :  { %v1285_v52 = vsel %vm1284_vm4, %v1279_v49, %v1282_v51 }
0x1894   :  { %1287 = vrot.lane.b32.xlu1 %v1285_v52, %s2242_s8 }
0x1898   :  { %1442 = vperm.xlu1 %2034, %v75_v63  }
0x189c   :  { %1447 = vperm.xlu1 %2034, %v76_v1  }
0x189f   :  { %v1438_v27 = vpop.permute.xlu0 %1437 }
0x18a0   :  { %1563 = vperm.xlu1 %2034, %v79_v2  }
0x18a3   :  { %v1453_v16 = vpop.permute.xlu0 %1452 }
0x1906   :  { %v1288_v53 = vpop.permute.xlu1 %1287 }
0x1907   :  { %1825 = vmatmul.mubr.msk.f32.vlgmr.msra.gmra.mrb[8].mxu1 %vm196_vm1, %v1288_v53 }
0x1908   :  { %1840 = vmatprep.mubr.msk.f32.mxu1 %vm1455_vm5, %v70_v62 }
0x1917   :  { %v1443_v28 = vpop.permute.xlu1 %1442 }
0x191b   :  { %v1448_v18 = vpop.permute.xlu1 %1447 }
0x191f   :  { %v1564_v9 = vpop.permute.xlu1 %1563 }
0x19da   :  { %v1357_v58 = vpop.f32.mrb[8].mxu1 }
0x19db   :  { %v1358_v59 = vadd.f32 %v1357_v58, %v64_v57  ;;  %v1826_v60 = vpop.f32.mrb[9].mxu1 }
0x19dd   :  { %v1361_v61 = vmax.f32 %v1358_v59, 0.0 }
0x19df   :  { %1836 = vmatmul.mubr.msk.f32.vlgmr.msra.gmra.mrb[10].mxu0 %vm196_vm1, %v1361_v61 }
0x19e0   :  { %1854 = vmatprep.mubr.msk.f32.mxu0 %vm2245_vm3, %v2243_v45 }
0x1ab2   :  { %v1431_v4 = vpop.f32.mrb[10].mxu0 }
0x1ab3   :  { %v1432_v5 = vadd.f32 %v1431_v4, %v69_v3  ;;  %v1837_v6 = vpop.f32.mrb[11].mxu0 }
0x1ab5   :  { %1838 = vmatprep.subr.msk.mxu1 %vm1468_vm6, %v1432_v5 }
0x1ab6   :  { %1839 = vmatpush3.msk.msra.mxu1 %vm1468_vm6, %v1432_v5 }
0x1ab7   :  { %1841 = vmatmul.mubr.msk.f32.vlgmr.msra.gmra.mrb[10].mxu1 %vm1455_vm5, %v71_v8  ;;  %2014 = vmatprep.subr.bf16.mxu1 %v2244_v35 }
0x1ab8   :  { %1843 = vmatprep.mubr.msk.f32.mxu1 %vm1455_vm5, %v72_v10  ;;  %2016 = vmatpush3.bf16.msra.mxu1 %v2015_v14 }
0x1abb   :  { %1844 = vmatmul.mubr.msk.f32.gmra.mrb[12].mxu1 %vm1455_vm5, %v73_v11 }
0x1abc   :  { %1861 = vmatprep.mubr.msk.f32.mxu1 %vm2245_vm3, %v2243_v45 }
0x1b8a   :  { %v1842_v33 = vpop.f32.mrb[10].mxu1 }
0x1b8b   :  { %v1544_v34 = vadd.f32 %v1842_v33, %v1443_v28  ;;  %v1538_v39 = vpop.f32.mrb[11].mxu1 }
0x1b8c   :  { %v1539_v40 = vadd.f32 %v1538_v39, %v1438_v27 }
0x1b8d   :  { %v1558_v44 = vmax.f32 %v1544_v34, 0.0 }
0x1b8e   :  { %v1557_v15 = vmax.f32 %v1539_v40, 0.0  ;;  %v1845_v17 = vpop.f32.mrb[12].mxu1 }
0x1b8f   :  { %v1554_v20 = vadd.f32 %v1845_v17, %v1453_v16  ;;  %v1548_v21 = vpop.f32.mrb[13].mxu1 }
0x1b90   :  { %v2009_v22 = vpack.c.bf16 %v1558_v44, %v1557_v15  ;;  %v1549_v19 = vadd.f32 %v1548_v21, %v1448_v18 }
0x1b91   :  { %v1560_v45 = vmax.f32 %v1554_v20, 0.0 }
0x1b92   :  { %v1559_v24 = vmax.f32 %v1549_v19, 0.0  ;;  %2010 = vmatpush3.bf16.msra.mxu0 %v2009_v22 }
0x1b93   :  { %2011 = vmatprep.subr.bf16.mxu0 %v2244_v35 }
0x1b94   :  { %v2012_v25 = vpack.c.bf16 %v1560_v45, %v1559_v24 }
0x1b96   :  { %2013 = vmatpush3.bf16.msra.mxu0 %v2012_v25 }
0x1b99   :  { %1855 = vmatmul.mubr.msk.f32.vlgmr.msra.gmra.mrb[12].mxu0 %vm196_vm1, %v78_v26 }
0x1c6c   :  { %v1635_v29 = vpop.f32.mrb[12].mxu0 }
0x1c6d   :  { %v1636_v30 = vadd.f32 %v1635_v29, %v1564_v9  ;;  %v1856_v50 = vpop.f32.mrb[13].mxu0 }
0x1c6f   :  { %1862 = vmatmul.mubr.msk.f32.vlgmr.msra.gmra.mrb[14].mxu1 %vm85_vm0, %v1636_v30 }
0x1d42   :  { %v1708_v31 = vpop.f32.mrb[14].mxu1 }
0x1d43   :  { %v1863_v32 = vpop.f32.mrb[15].mxu1  ;;  %v1719_v36 = vrot.slane %v1708_v31, 2  ;;  %v1714_v37 = vrot.slane %v1708_v31, 1  ;;  %v1724_v35 = vrot.slane %v1708_v31, 3  ;;  %v1712_v41 = vadd.f32 %v1708_v31, %v82_v38 }
0x1d45   :  { %1720 = vrot.lane.b32.xlu1 %v1719_v36, %s2247_s9  ;;  %1715 = vrot.lane.b32.xlu0 %v1714_v37, %s2248_s10 }
0x1d49   :  { %1725 = vrot.lane.b32.xlu0 %v1724_v35, %s2249_s11 }
0x1db7   :  { %v1716_v42 = vpop.permute.xlu0 %1715  ;;  %v1721_v46 = vpop.permute.xlu1 %1720 }
0x1db8   :  { %v1718_v43 = vadd.f32 %v1716_v42, %v1712_v41 }
0x1dba   :  { %v1723_v47 = vadd.f32 %v1721_v46, %v1718_v43 }
0x1dbb   :  { %v1726_v48 = vpop.permute.xlu0 %1725 }
0x1dbc   :  { %v1728_v49 = vadd.f32 %v1726_v48, %v1723_v47 }
0x1dbe   :  { %1730 = vst.msk [vmem:[#allocation7] sm:$0x1] %vm1729_vm7, %v1728_v49 }
0x1dbf   :  { %2218 = shalt.err (!%p2215_p6)
}
0x1dc0   :  { %s2219_s18 = scalar_lea.hbm %s2524_s2, 16 }
0x1dc1   :  { %p2220_p7 = scmp.ne.s32.totalorder %s2524_s2, %s2219_s18  ;;  %p2223_p8 = scmp.lt.u32.totalorder %s2219_s18, %s2524_s2 }
0x1dc3   :  { %p2225_p9 = pnand %p2223_p8, %p2220_p7 }
0x1dc5   :  { %2228 = shalt.err (!%p2225_p9)
}
0x1dc6   :  { %1740 = dma.vmem_to_hbm [thread:$0]  %s1738_s13, 16, %s2524_s2, [#allocation4]  }
0x1dc7   :  { %2233 = dma.done.wait [#allocation4], 16  }
0x1dc8   :  { %2234 = vsyncadd [#allocation4], 4294967280 }
0x1dc9   :  { %1744 = vsyncpa [#allocation3], 1 }
0x1dca   :  { %1745 = vsyncpa [#allocation6], 1 }
0x1dcb   :  { %1746 = vsyncpa [#allocation4], 1 }

</bundles_post_ra>
